<compile_context>
chip_gen: v7x
topology: tpu7x:2x2x1
jax: 0.10.0
libtpu: 0.0.40
codegen_flags: <defaults>
</compile_context>

<pallas_src>
import jax
import jax.numpy as jnp
import numpy as np
from jax.experimental import pallas as pl
from jax.experimental.pallas import tpu as pltpu

N_CLASSES = 15
C_OUT = 50                      # conv output channels
KD, KH, KW = 20, 20, 3
POOL_LEN = 25                   # MaxPool1d(3, stride=3, dilation=2) output length (needs Wout == 77)
PATCH = KD * KH * KW            # 1200-long im2col patch
C_PAD = 128                     # conv channels padded to a full lane width
H1, H2 = 512, 100
H2_PAD = 128
OUT_PAD = 128
DROP_P = 0.5                    # F.dropout default (module's dropout_p=0.4 is unused in forward())


def _round_up(x, m):
    return (x + m - 1) // m * m


# ---------------------------------------------------------------------------
# Fused kernel.  Grid = (batch_tiles, POOL_LEN).
#   conv(im2col matmul) + dilated max-pool + ReLU + fc1-accumulate each step;
#   fc1 bias/ReLU/dropout + fc2 + ReLU/dropout + fc3 at the last pool position.
# ---------------------------------------------------------------------------
def fused_kernel(p_ref, wc_ref, bc_ref, w1_ref, b1_ref, w2_ref, b2_ref,
                 w3_ref, b3_ref, m1_ref, m2_ref, out_ref, acc_ref):
    p = pl.program_id(1)

    @pl.when(p == 0)
    def _():
        acc_ref[...] = jnp.zeros_like(acc_ref)

    pt = p_ref[0]                                   # (3, TN, PATCH): the 3 dilated pool taps
    tn = pt.shape[1]
    # One MXU matmul for all 3 taps (RHS stays pushed), then max over taps.
    s = jnp.dot(pt.reshape(3 * tn, PATCH), wc_ref[...],
                preferred_element_type=jnp.float32)               # (3*TN, 128)
    pooled = jnp.maximum(jnp.maximum(s[:tn], s[tn:2 * tn]), s[2 * tn:])
    # per-channel bias commutes with the max over positions -> add after the pool
    pooled = jnp.maximum(pooled + bc_ref[...], 0.0)               # (TN, 128)

    # fc1 as a reduction over pool positions: stream this position's (128,512) weight slice.
    acc_ref[...] += jnp.dot(pooled, w1_ref[0], preferred_element_type=jnp.float32)

    @pl.when(p == pl.num_programs(1) - 1)
    def _():
        h1 = jnp.maximum(acc_ref[...] + b1_ref[...], 0.0) * m1_ref[...]
        h2 = jnp.dot(h1, w2_ref[...], preferred_element_type=jnp.float32)
        h2 = jnp.maximum(h2 + b2_ref[...], 0.0) * m2_ref[...]
        out_ref[...] = (jnp.dot(h2, w3_ref[...], preferred_element_type=jnp.float32)
                        + b3_ref[...])


# ---------------------------------------------------------------------------
# Wrapper: im2col + lane-dense parameter layouts + the single pallas_call.
# ---------------------------------------------------------------------------
def net_forward(x, params, drop_mask1, drop_mask2):
    """x: (N, 1, 20, 20, W) with W == 79.
    drop_mask1/2: inverted-dropout multipliers (values in {0, 1/keep}) of shape
    (N, 512) and (N, 100)."""
    w_conv, b_conv, w1, b1, w2, b2, w3, b3 = params
    N, W = x.shape[0], x.shape[-1]
    Wout = W - (KW - 1)
    assert (Wout - 2 * (KW - 1) - 1) // 3 + 1 == POOL_LEN, \
        "W must yield 25 pooled positions (required by view(-1, 50*25) in forward)"

    tn = min(256, _round_up(N, 8))          # batch-tile rows per grid step
    n_pad = _round_up(N, tn)
    nb = n_pad // tn

    # ---- im2col (XLA glue).
    # TODO(synk): for large N, build the 3 shifted views in-kernel from x
    # (memory_space=pl.ANY + manual DMA) to avoid the ~3x im2col HBM inflation.
    x0 = x[:, 0]                                                        # (N,20,20,W)
    windows = jnp.stack([x0[..., k:k + Wout] for k in range(KW)], axis=-1)   # (N,20,20,Wout,3)
    # MaxPool1d(3, stride 3, dilation 2): output p uses conv positions 3p, 3p+2, 3p+4
    pos = 3 * np.arange(POOL_LEN)[:, None] + 2 * np.arange(3)[None, :]  # (25,3)
    sel = windows[:, :, :, pos, :]                                      # (N,20,20,25,3,3)
    patches = sel.transpose(3, 4, 0, 1, 2, 5).reshape(POOL_LEN, 3, N, PATCH)
    patches = jnp.pad(patches, ((0, 0), (0, 0), (0, n_pad - N), (0, 0)))

    # ---- parameters in lane-dense, kernel-friendly layouts (static, one-time work)
    wc = jnp.pad(w_conv.reshape(C_OUT, PATCH).T, ((0, 0), (0, C_PAD - C_OUT)))  # (1200,128)
    bc = jnp.pad(b_conv, (0, C_PAD - C_OUT)).reshape(1, C_PAD)
    # fc1 weight re-ordered to consume (position, padded-channel) features directly:
    # this folds PyTorch's channel-major flatten into the weight (no runtime transpose).
    w1r = w1.reshape(H1, C_OUT, POOL_LEN).transpose(2, 1, 0)                    # (25,50,512)
    w1r = jnp.pad(w1r, ((0, 0), (0, C_PAD - C_OUT), (0, 0)))                    # (25,128,512)
    b1r = b1.reshape(1, H1)
    w2p = jnp.pad(w2.T, ((0, 0), (0, H2_PAD - H2)))                             # (512,128)
    b2p = jnp.pad(b2, (0, H2_PAD - H2)).reshape(1, H2_PAD)
    w3p = jnp.pad(w3.T, ((0, H2_PAD - H2), (0, OUT_PAD - N_CLASSES)))           # (128,128)
    b3p = jnp.pad(b3, (0, OUT_PAD - N_CLASSES)).reshape(1, OUT_PAD)

    m1 = jnp.pad(drop_mask1, ((0, n_pad - N), (0, 0)))                          # (n_pad,512)
    m2 = jnp.pad(drop_mask2, ((0, n_pad - N), (0, H2_PAD - H2)))                # (n_pad,128)

    out = pl.pallas_call(
        fused_kernel,
        grid=(nb, POOL_LEN),
        in_specs=[
            pl.BlockSpec((1, 3, tn, PATCH), lambda b, p: (p, 0, b, 0)),   # patches
            pl.BlockSpec((PATCH, C_PAD), lambda b, p: (0, 0)),            # conv weight (resident)
            pl.BlockSpec((1, C_PAD), lambda b, p: (0, 0)),                # conv bias
            pl.BlockSpec((1, C_PAD, H1), lambda b, p: (p, 0, 0)),         # fc1 weight slice (streamed)
            pl.BlockSpec((1, H1), lambda b, p: (0, 0)),                   # fc1 bias
            pl.BlockSpec((H1, H2_PAD), lambda b, p: (0, 0)),              # fc2 weight (resident)
            pl.BlockSpec((1, H2_PAD), lambda b, p: (0, 0)),               # fc2 bias
            pl.BlockSpec((H2_PAD, OUT_PAD), lambda b, p: (0, 0)),         # fc3 weight (resident)
            pl.BlockSpec((1, OUT_PAD), lambda b, p: (0, 0)),              # fc3 bias
            pl.BlockSpec((tn, H1), lambda b, p: (b, 0)),                  # dropout mask 1
            pl.BlockSpec((tn, H2_PAD), lambda b, p: (b, 0)),              # dropout mask 2
        ],
        out_specs=pl.BlockSpec((tn, OUT_PAD), lambda b, p: (b, 0)),
        out_shape=jax.ShapeDtypeStruct((n_pad, OUT_PAD), jnp.float32),
        scratch_shapes=[pltpu.VMEM((tn, H1), jnp.float32)],               # fc1 accumulator
        compiler_params=pltpu.CompilerParams(
            dimension_semantics=("parallel", "arbitrary")),               # batch tiles -> 2 TCs on v7x
    )(patches, wc, bc, w1r, b1r, w2p, b2p, w3p, b3p, m1, m2)

    return out[:N, :N_CLASSES]


def make_dropout_masks(key, n):
    keep = 1.0 - DROP_P
    k1, k2 = jax.random.split(key)
    m1 = jax.random.bernoulli(k1, keep, (n, H1)).astype(jnp.float32) / keep
    m2 = jax.random.bernoulli(k2, keep, (n, H2)).astype(jnp.float32) / keep
    return m1, m2


def init_params(key):
    ks = jax.random.split(key, 8)

    def u(k, shape, fan_in):
        bound = 1.0 / np.sqrt(fan_in)
        return jax.random.uniform(k, shape, jnp.float32, -bound, bound)

    w_conv = u(ks[0], (C_OUT, 1, KD, KH, KW), PATCH)
    b_conv = u(ks[1], (C_OUT,), PATCH)
    w1 = u(ks[2], (H1, C_OUT * POOL_LEN), C_OUT * POOL_LEN)
    b1 = u(ks[3], (H1,), C_OUT * POOL_LEN)
    w2 = u(ks[4], (H2, H1), H1)
    b2 = u(ks[5], (H2,), H1)
    w3 = u(ks[6], (N_CLASSES, H2), H2)
    b3 = u(ks[7], (N_CLASSES,), H2)
    return (w_conv, b_conv, w1, b1, w2, b2, w3, b3)


if __name__ == "__main__":
    key = jax.random.PRNGKey(0)
    kx, kp, kd = jax.random.split(key, 3)

    # W=79 -> conv length 77 -> MaxPool1d(3,3,dilation=2) length 25, as required
    # by the double-squeeze + view(-1, 50*25) in the PyTorch forward.
    N, W = 4, 79
    x = jax.random.normal(kx, (N, 1, KD, KH, W), jnp.float32)
    params = init_params(kp)
    m1, m2 = make_dropout_masks(kd, N)

    out = jax.block_until_ready(net_forward(x, params, m1, m2))
    assert out.shape == (N, N_CLASSES)

    # Pure-JAX reference of the same forward pass (same dropout masks).
    w_conv, b_conv, w1, b1, w2, b2, w3, b3 = params
    Wout = W - (KW - 1)
    x0 = x[:, 0]
    windows = jnp.stack([x0[..., k:k + Wout] for k in range(KW)], axis=-1)
    conv = jnp.einsum('ndhwk,cdhk->ncw', windows, w_conv[:, 0]) + b_conv[None, :, None]
    pos = 3 * np.arange(POOL_LEN)[:, None] + 2 * np.arange(3)[None, :]
    feat = jnp.maximum(conv[:, :, pos].max(-1), 0.0).reshape(N, C_OUT * POOL_LEN)
    h1 = jnp.maximum(feat @ w1.T + b1, 0.0) * m1
    h2 = jnp.maximum(h1 @ w2.T + b2, 0.0) * m2
    ref = h2 @ w3.T + b3

    np.testing.assert_allclose(np.asarray(out), np.asarray(ref), rtol=2e-2, atol=2e-2)
    print("KERNEL_OK")
</pallas_src>

<mosaic_0001>
module attributes {stable_mosaic.version = 11 : i64} {
  func.func @fused_kernel(%arg0: i32, %arg1: i32, %arg2: memref<1x3x8x1200xf32, #tpu.memory_space<vmem>>, %arg3: memref<1200x128xf32, #tpu.memory_space<vmem>>, %arg4: memref<1x128xf32, #tpu.memory_space<vmem>>, %arg5: memref<1x128x512xf32, #tpu.memory_space<vmem>>, %arg6: memref<1x512xf32, #tpu.memory_space<vmem>>, %arg7: memref<512x128xf32, #tpu.memory_space<vmem>>, %arg8: memref<1x128xf32, #tpu.memory_space<vmem>>, %arg9: memref<128x128xf32, #tpu.memory_space<vmem>>, %arg10: memref<1x128xf32, #tpu.memory_space<vmem>>, %arg11: memref<8x512xf32, #tpu.memory_space<vmem>>, %arg12: memref<8x128xf32, #tpu.memory_space<vmem>>, %arg13: memref<8x128xf32, #tpu.memory_space<vmem>>, %arg14: memref<8x512xf32, #tpu.memory_space<vmem>>) attributes {dimension_semantics = [#tpu.dimension_semantics<parallel>, #tpu.dimension_semantics<arbitrary>], iteration_bounds = array<i64: 1, 25>, scalar_prefetch = 0 : i64, scratch_operands = 1 : i64, tpu.core_type = #tpu.core_type<tc>, window_params = [{transform_indices = @transform_0, window_bounds = array<i64: 1, 3, 8, 1200>}, {pipeline_mode = #tpu.pipeline_mode<synchronous>, transform_indices = @transform_1, window_bounds = array<i64: 1200, 128>}, {pipeline_mode = #tpu.pipeline_mode<synchronous>, transform_indices = @transform_2, window_bounds = array<i64: 1, 128>}, {transform_indices = @transform_3, window_bounds = array<i64: 1, 128, 512>}, {pipeline_mode = #tpu.pipeline_mode<synchronous>, transform_indices = @transform_4, window_bounds = array<i64: 1, 512>}, {pipeline_mode = #tpu.pipeline_mode<synchronous>, transform_indices = @transform_5, window_bounds = array<i64: 512, 128>}, {pipeline_mode = #tpu.pipeline_mode<synchronous>, transform_indices = @transform_6, window_bounds = array<i64: 1, 128>}, {pipeline_mode = #tpu.pipeline_mode<synchronous>, transform_indices = @transform_7, window_bounds = array<i64: 128, 128>}, {pipeline_mode = #tpu.pipeline_mode<synchronous>, transform_indices = @transform_8, window_bounds = array<i64: 1, 128>}, {transform_indices = @transform_9, window_bounds = array<i64: 8, 512>}, {transform_indices = @transform_10, window_bounds = array<i64: 8, 128>}, {transform_indices = @transform_11, window_bounds = array<i64: 8, 128>}]} {
    %c0_i32 = arith.constant 0 : i32
    %0 = arith.cmpi eq, %arg1, %c0_i32 : i32
    %1 = arith.extui %0 : i1 to i32
    %c0_i32_0 = arith.constant 0 : i32
    %2 = arith.cmpi ne, %1, %c0_i32_0 : i32
    scf.if %2 {
      %cst_18 = arith.constant 0.000000e+00 : f32
      %27 = vector.broadcast %cst_18 : f32 to vector<8x512xf32>
      %c0_19 = arith.constant 0 : index
      %c0_20 = arith.constant 0 : index
      %28 = vector.load %arg14[%c0_19, %c0_20] : memref<8x512xf32, #tpu.memory_space<vmem>>, vector<8x512xf32>
      tpu.vector_store %arg14[%c0_19, %c0_20], %27 {strides = array<i32>} : memref<8x512xf32, #tpu.memory_space<vmem>>, vector<8x512xf32>,
    } else {
    }
    %c0 = arith.constant 0 : index
    %c0_1 = arith.constant 0 : index
    %c0_2 = arith.constant 0 : index
    %c0_3 = arith.constant 0 : index
    %3 = vector.load %arg2[%c0, %c0_1, %c0_2, %c0_3] : memref<1x3x8x1200xf32, #tpu.memory_space<vmem>>, vector<1x3x8x1200xf32>
    %4 = vector.shape_cast %3 : vector<1x3x8x1200xf32> to vector<3x8x1200xf32>
    %5 = vector.shape_cast %4 : vector<3x8x1200xf32> to vector<24x1200xf32>
    %c0_4 = arith.constant 0 : index
    %c0_5 = arith.constant 0 : index
    %6 = vector.load %arg3[%c0_4, %c0_5] : memref<1200x128xf32, #tpu.memory_space<vmem>>, vector<1200x128xf32>
    %cst = arith.constant dense<0.000000e+00> : vector<24x128xf32>
    %7 = tpu.matmul %5, %6, %cst {dimension_numbers = #tpu.dot_dimension_numbers<[1], [0], [0], [1], [0, 0, 1, 1], [], []>} : vector<24x1200xf32>, vector<1200x128xf32>, vector<24x128xf32> -> vector<24x128xf32>
    %8 = vector.extract_strided_slice %7 {offsets = [0, 0], sizes = [8, 128], strides = [1, 1]} : vector<24x128xf32> to vector<8x128xf32>
    %9 = vector.extract_strided_slice %7 {offsets = [8, 0], sizes = [8, 128], strides = [1, 1]} : vector<24x128xf32> to vector<8x128xf32>
    %10 = arith.maximumf %8, %9 : vector<8x128xf32>
    %11 = vector.extract_strided_slice %7 {offsets = [16, 0], sizes = [8, 128], strides = [1, 1]} : vector<24x128xf32> to vector<8x128xf32>
    %12 = arith.maximumf %10, %11 : vector<8x128xf32>
    %c0_6 = arith.constant 0 : index
    %c0_7 = arith.constant 0 : index
    %13 = vector.load %arg4[%c0_6, %c0_7] : memref<1x128xf32, #tpu.memory_space<vmem>>, vector<1x128xf32>
    %14 = vector.broadcast %13 : vector<1x128xf32> to vector<8x128xf32>
    %15 = arith.addf %12, %14 : vector<8x128xf32>
    %cst_8 = arith.constant 0.000000e+00 : f32
    %16 = vector.broadcast %cst_8 : f32 to vector<8x128xf32>
    %17 = arith.maximumf %15, %16 : vector<8x128xf32>
    %c0_9 = arith.constant 0 : index
    %c0_10 = arith.constant 0 : index
    %18 = vector.load %arg14[%c0_9, %c0_10] : memref<8x512xf32, #tpu.memory_space<vmem>>, vector<8x512xf32>
    %c0_11 = arith.constant 0 : index
    %c0_12 = arith.constant 0 : index
    %c0_13 = arith.constant 0 : index
    %19 = vector.load %arg5[%c0_11, %c0_12, %c0_13] : memref<1x128x512xf32, #tpu.memory_space<vmem>>, vector<1x128x512xf32>
    %20 = vector.shape_cast %19 : vector<1x128x512xf32> to vector<128x512xf32>
    %cst_14 = arith.constant dense<0.000000e+00> : vector<8x512xf32>
    %21 = tpu.matmul %17, %20, %cst_14 {dimension_numbers = #tpu.dot_dimension_numbers<[1], [0], [0], [1], [0, 0, 1, 1], [], []>} : vector<8x128xf32>, vector<128x512xf32>, vector<8x512xf32> -> vector<8x512xf32>
    %22 = arith.addf %18, %21 : vector<8x512xf32>
    %c0_15 = arith.constant 0 : index
    %c0_16 = arith.constant 0 : index
    %23 = vector.load %arg14[%c0_15, %c0_16] : memref<8x512xf32, #tpu.memory_space<vmem>>, vector<8x512xf32>
    tpu.vector_store %arg14[%c0_15, %c0_16], %22 {strides = array<i32>} : memref<8x512xf32, #tpu.memory_space<vmem>>, vector<8x512xf32>,
    %c24_i32 = arith.constant 24 : i32
    %24 = arith.cmpi eq, %arg1, %c24_i32 : i32
    %25 = arith.extui %24 : i1 to i32
    %c0_i32_17 = arith.constant 0 : i32
    %26 = arith.cmpi ne, %25, %c0_i32_17 : i32
    scf.if %26 {
      %c0_18 = arith.constant 0 : index
      %c0_19 = arith.constant 0 : index
      %27 = vector.load %arg14[%c0_18, %c0_19] : memref<8x512xf32, #tpu.memory_space<vmem>>, vector<8x512xf32>
      %c0_20 = arith.constant 0 : index
      %c0_21 = arith.constant 0 : index
      %28 = vector.load %arg6[%c0_20, %c0_21] : memref<1x512xf32, #tpu.memory_space<vmem>>, vector<1x512xf32>
      %29 = vector.broadcast %28 : vector<1x512xf32> to vector<8x512xf32>
      %30 = arith.addf %27, %29 : vector<8x512xf32>
      %cst_22 = arith.constant 0.000000e+00 : f32
      %31 = vector.broadcast %cst_22 : f32 to vector<8x512xf32>
      %32 = arith.maximumf %30, %31 : vector<8x512xf32>
      %c0_23 = arith.constant 0 : index
      %c0_24 = arith.constant 0 : index
      %33 = vector.load %arg11[%c0_23, %c0_24] : memref<8x512xf32, #tpu.memory_space<vmem>>, vector<8x512xf32>
      %34 = arith.mulf %32, %33 : vector<8x512xf32>
      %c0_25 = arith.constant 0 : index
      %c0_26 = arith.constant 0 : index
      %35 = vector.load %arg7[%c0_25, %c0_26] : memref<512x128xf32, #tpu.memory_space<vmem>>, vector<512x128xf32>
      %cst_27 = arith.constant dense<0.000000e+00> : vector<8x128xf32>
      %36 = tpu.matmul %34, %35, %cst_27 {dimension_numbers = #tpu.dot_dimension_numbers<[1], [0], [0], [1], [0, 0, 1, 1], [], []>} : vector<8x512xf32>, vector<512x128xf32>, vector<8x128xf32> -> vector<8x128xf32>
      %c0_28 = arith.constant 0 : index
      %c0_29 = arith.constant 0 : index
      %37 = vector.load %arg8[%c0_28, %c0_29] : memref<1x128xf32, #tpu.memory_space<vmem>>, vector<1x128xf32>
      %38 = vector.broadcast %37 : vector<1x128xf32> to vector<8x128xf32>
      %39 = arith.addf %36, %38 : vector<8x128xf32>
      %cst_30 = arith.constant 0.000000e+00 : f32
      %40 = vector.broadcast %cst_30 : f32 to vector<8x128xf32>
      %41 = arith.maximumf %39, %40 : vector<8x128xf32>
      %c0_31 = arith.constant 0 : index
      %c0_32 = arith.constant 0 : index
      %42 = vector.load %arg12[%c0_31, %c0_32] : memref<8x128xf32, #tpu.memory_space<vmem>>, vector<8x128xf32>
      %43 = arith.mulf %41, %42 : vector<8x128xf32>
      %c0_33 = arith.constant 0 : index
      %c0_34 = arith.constant 0 : index
      %44 = vector.load %arg9[%c0_33, %c0_34] : memref<128x128xf32, #tpu.memory_space<vmem>>, vector<128x128xf32>
      %cst_35 = arith.constant dense<0.000000e+00> : vector<8x128xf32>
      %45 = tpu.matmul %43, %44, %cst_35 {dimension_numbers = #tpu.dot_dimension_numbers<[1], [0], [0], [1], [0, 0, 1, 1], [], []>} : vector<8x128xf32>, vector<128x128xf32>, vector<8x128xf32> -> vector<8x128xf32>
      %c0_36 = arith.constant 0 : index
      %c0_37 = arith.constant 0 : index
      %46 = vector.load %arg10[%c0_36, %c0_37] : memref<1x128xf32, #tpu.memory_space<vmem>>, vector<1x128xf32>
      %47 = vector.broadcast %46 : vector<1x128xf32> to vector<8x128xf32>
      %48 = arith.addf %45, %47 : vector<8x128xf32>
      %c0_38 = arith.constant 0 : index
      %c0_39 = arith.constant 0 : index
      %49 = vector.load %arg13[%c0_38, %c0_39] : memref<8x128xf32, #tpu.memory_space<vmem>>, vector<8x128xf32>
      tpu.vector_store %arg13[%c0_38, %c0_39], %48 {strides = array<i32>} : memref<8x128xf32, #tpu.memory_space<vmem>>, vector<8x128xf32>,
    } else {
    }
    return
  }
  func.func @transform_0(%arg0: i32, %arg1: i32) -> (i32, i32, i32, i32) {
    %c0_i32 = arith.constant 0 : i32
    %c0_i32_0 = arith.constant 0 : i32
    %c0_i32_1 = arith.constant 0 : i32
    return %arg1, %c0_i32, %arg0, %c0_i32_0 : i32, i32, i32, i32
  }
  func.func @transform_1(%arg0: i32, %arg1: i32) -> (i32, i32) {
    %c0_i32 = arith.constant 0 : i32
    %c0_i32_0 = arith.constant 0 : i32
    %c0_i32_1 = arith.constant 0 : i32
    return %c0_i32, %c0_i32_0 : i32, i32
  }
  func.func @transform_2(%arg0: i32, %arg1: i32) -> (i32, i32) {
    %c0_i32 = arith.constant 0 : i32
    %c0_i32_0 = arith.constant 0 : i32
    %c0_i32_1 = arith.constant 0 : i32
    return %c0_i32, %c0_i32_0 : i32, i32
  }
  func.func @transform_3(%arg0: i32, %arg1: i32) -> (i32, i32, i32) {
    %c0_i32 = arith.constant 0 : i32
    %c0_i32_0 = arith.constant 0 : i32
    %c0_i32_1 = arith.constant 0 : i32
    return %arg1, %c0_i32, %c0_i32_0 : i32, i32, i32
  }
  func.func @transform_4(%arg0: i32, %arg1: i32) -> (i32, i32) {
    %c0_i32 = arith.constant 0 : i32
    %c0_i32_0 = arith.constant 0 : i32
    %c0_i32_1 = arith.constant 0 : i32
    return %c0_i32, %c0_i32_0 : i32, i32
  }
  func.func @transform_5(%arg0: i32, %arg1: i32) -> (i32, i32) {
    %c0_i32 = arith.constant 0 : i32
    %c0_i32_0 = arith.constant 0 : i32
    %c0_i32_1 = arith.constant 0 : i32
    return %c0_i32, %c0_i32_0 : i32, i32
  }
  func.func @transform_6(%arg0: i32, %arg1: i32) -> (i32, i32) {
    %c0_i32 = arith.constant 0 : i32
    %c0_i32_0 = arith.constant 0 : i32
    %c0_i32_1 = arith.constant 0 : i32
    return %c0_i32, %c0_i32_0 : i32, i32
  }
  func.func @transform_7(%arg0: i32, %arg1: i32) -> (i32, i32) {
    %c0_i32 = arith.constant 0 : i32
    %c0_i32_0 = arith.constant 0 : i32
    %c0_i32_1 = arith.constant 0 : i32
    return %c0_i32, %c0_i32_0 : i32, i32
  }
  func.func @transform_8(%arg0: i32, %arg1: i32) -> (i32, i32) {
    %c0_i32 = arith.constant 0 : i32
    %c0_i32_0 = arith.constant 0 : i32
    %c0_i32_1 = arith.constant 0 : i32
    return %c0_i32, %c0_i32_0 : i32, i32
  }
  func.func @transform_9(%arg0: i32, %arg1: i32) -> (i32, i32) {
    %c0_i32 = arith.constant 0 : i32
    %c0_i32_0 = arith.constant 0 : i32
    return %arg0, %c0_i32 : i32, i32
  }
  func.func @transform_10(%arg0: i32, %arg1: i32) -> (i32, i32) {
    %c0_i32 = arith.constant 0 : i32
    %c0_i32_0 = arith.constant 0 : i32
    return %arg0, %c0_i32 : i32, i32
  }
  func.func @transform_11(%arg0: i32, %arg1: i32) -> (i32, i32) {
    %c0_i32 = arith.constant 0 : i32
    %c0_i32_0 = arith.constant 0 : i32
    return %arg0, %c0_i32 : i32, i32
  }
}

</mosaic_0001>

<bundles_post_ra>
// kernel: tpu_custom_call.1
= control target key start
LH: loop header
LB: loop body
LE: loop exit
PB: predicated region body
PF: predicated region fallthrough
CT: control target
= control target key end

     0   :  { %s3799_s0 = inlined_call_operand.hbm [shape: f32[25,3,8,1200], index: 0, kind: input, shape index: {}]   ;;  %s3800_s1 = inlined_call_operand.hbm [shape: f32[1200,128], index: 1, kind: input, shape index: {}]   ;;  %s3801_s2 = inlined_call_operand.hbm [shape: f32[1,128], index: 2, kind: input, shape index: {}]   ;;  %s3802_s3 = inlined_call_operand.hbm [shape: f32[25,128,512], index: 3, kind: input, shape index: {}]   ;;  %s3803_s4 = inlined_call_operand.hbm [shape: f32[1,512], index: 4, kind: input, shape index: {}]   ;;  %s3804_s5 = inlined_call_operand.hbm [shape: f32[512,128], index: 5, kind: input, shape index: {}]   ;;  %s3805_s6 = inlined_call_operand.hbm [shape: f32[1,128], index: 6, kind: input, shape index: {}]   ;;  %s3806_s7 = inlined_call_operand.hbm [shape: f32[128,128], index: 7, kind: input, shape index: {}]   ;;  %s3807_s8 = inlined_call_operand.hbm [shape: f32[1,128], index: 8, kind: input, shape index: {}]   ;;  %s3808_s9 = inlined_call_operand.hbm [shape: f32[8,512], index: 9, kind: input, shape index: {}]   ;;  %s3809_s10 = inlined_call_operand.hbm [shape: f32[8,128], index: 10, kind: input, shape index: {}]   ;;  %s3810_s11 = inlined_call_operand.hbm [shape: f32[8,128], index: 11, kind: output, shape index: {}]  }
   0x1   :  { %3818 = sst [smem:[#allocation32_spill]] %s3799_s0 }
   0x2   :  { %3819 = sst [smem:[#allocation33_spill]] %s3800_s1 }
   0x3   :  { %3820 = sst [smem:[#allocation34_spill]] %s3801_s2 }
   0x4   :  { %3821 = sst [smem:[#allocation35_spill]] %s3802_s3 }
   0x5   :  { %3822 = sst [smem:[#allocation36_spill]] %s3803_s4 }
   0x6   :  { %3823 = sst [smem:[#allocation37_spill]] %s3804_s5 }
   0x7   :  { %3824 = sst [smem:[#allocation38_spill]] %s3810_s11 }
   0x8   :  { %16 = vsyncpa [#allocation4], 0 }
   0x9   :  { %18 = vsyncpa [#allocation4 + $0x1], 0 }
   0xa   :  { %19 = vsyncpa [#allocation7], 0 }
   0xb   :  { %20 = vsyncpa [#allocation10], 0 }
   0xc   :  { %22 = vsyncpa [#allocation10 + $0x1], 0 }
   0xd   :  { %23 = vsyncpa [#allocation13], 0 }
   0xe   :  { %24 = vsyncpa [#allocation16], 0 }
   0xf   :  { %25 = vsyncpa [#allocation19], 0 }
  0x10   :  { %26 = vsyncpa [#allocation5], 0  ;;  %s3267_s17 = smov 0   ;;  %s3269_s18 = smov 0  }
  0x11   :  { %s3271_s19 = smov 0   ;;  %s3273_s20 = smov 0  }
  0x12   :  { %s3275_s21 = smov 0   ;;  %s3277_s22 = smov 0  }
  0x13 LB: > { %3825 = sst [smem:[#allocation30_spill]] %s3173_s20  ;;  %s3298_s23 = sadd.s32 4294967295, %s3181_s22   ;;  %s3181_s22 = sphi %s3277_s22, %s32_s22   ;;  %s3177_s21 = sphi %s3275_s21, %s3858_s21   ;;  %s3173_s20 = sphi %s3273_s20, %s3857_s20   ;;  %s3169_s19 = sphi %s3271_s19, %s3856_s19   ;;  %s3165_s18 = sphi %s3269_s18, %s3855_s18   ;;  %s3161_s17 = sphi %s3267_s17, %s3854_s17  }
  0x14   : > { %p1954_p0 = scmp.ge.s32.totalorder %s3181_s22, 1  ;;  %p3815_p1 = scmp.eq.s32.totalorder %s3298_s23, 0 }
  0x15   : > { %p328_p2 = scmp.lt.s32.totalorder %s3181_s22, 26  ;;  %s3183_s25 = smov [#allocation6]  }
  0x16   : > { %s340_s26 = sshll.u32 %s3183_s25, 4  ;;  %s3184_s28 = smov [#allocation11]   ;;  %s3307_s26 = int_to_ptr.vmem [resolvable:$true] %s340_s26 }
  0x17   : > { %p3303_p3 = pnand %p1954_p0, %p328_p2  ;;  %s365_s29 = sshll.u32 %s3184_s28, 4  ;;  %s3317_s29 = int_to_ptr.vmem [resolvable:$true] %s365_s29 }
  0x18   : > { %s3185_s30 = smov [#allocation12]   ;;  %s3829_s1 = sld [smem:[#allocation33_spill]] }
  0x19   : > { %s3826_s24 = scalar_select %p3303_p3, 1, 0 }
  0x1a   : > { %p2639_p4 = pneg %p3303_p3  ;;  %s3319_s12 = sshll.u32 %s3185_s30, 4  ;;  %s376_s12 = int_to_ptr.vmem [resolvable:$true] %s3319_s12 }
  0x1b   : > { %3827 = sst [smem:[#allocation31_spill]] %s3826_s24 }
  0x1c   : > { %p3313_p5 = pnand %p2639_p4, %p3815_p1 }
  0x1e   : > { %s2765_s15 = scalar_lea.hbm %s3829_s1, 19200  ;;  %p3329_p7 = pneg %p3313_p5 }
  0x1f   : > { %p2766_p6 = scmp.ne.s32.totalorder %s3829_s1, %s2765_s15  ;;  %p2772_p10 = scmp.lt.u32.totalorder %s2765_s15, %s3829_s1 }
  0x21   : > { %p2768_p8 = pnand %p3329_p7, %p2766_p6 }
  0x23   : > { %p2769_p9 = pneg %p2768_p8 }
  0x25   : > { %p2774_p11 = pnand %p2772_p10, %p2769_p9 }
  0x27   : > { %2777 = shalt.err (!%p2774_p11)
}
  0x28   : > { %s2778_s13 = scalar_lea.vmem %s3307_s26, 19200  ;;  %p2786_p2 = scmp.lt.s32.totalorder %s3307_s26, %s3307_s26 }
  0x29   : > { %p2779_p12 = scmp.ne.s32.totalorder %s3307_s26, %s2778_s13  ;;  %p2787_p4 = scmp.lt.s32.totalorder %s2778_s13, %s2778_s13 }
  0x2b   : > { %p2781_p13 = pnand %p2779_p12, %p3329_p7  ;;  %p2788_p6 = por %p2787_p4, %p2786_p2 }
  0x2d   : > { %p2782_p0 = pneg %p2781_p13 }
  0x2f   : > { %p2789_p8 = pnand %p2788_p6, %p2782_p0 }
  0x31   : > { %2792 = shalt.err (!%p2789_p8)
}
  0x32   : > { %s3186_s14 = smov 128   ;;  %s3187_s15 = smov 8  }
  0x33   : > { %2642 = dma.hbm_to_vmem [thread:$0]  (!%p3313_p5), %s3829_s1, 19200, %s3307_s26, [#allocation7], %s3186_s14, %s3186_s14, %s3187_s15  }
  0x34   : > { %s3831_s4 = sld [smem:[#allocation36_spill]] }
  0x3a   : > { %s2793_s13 = scalar_lea.hbm %s3831_s4, 64 }
  0x3b   : > { %p2794_p9 = scmp.ne.s32.totalorder %s3831_s4, %s2793_s13  ;;  %p2800_p12 = scmp.lt.u32.totalorder %s2793_s13, %s3831_s4 }
  0x3d   : > { %p2796_p10 = pnand %p2794_p9, %p3329_p7 }
  0x3f   : > { %p2797_p11 = pneg %p2796_p10 }
  0x41   : > { %p2802_p13 = pnand %p2800_p12, %p2797_p11 }
  0x43   : > { %2805 = shalt.err (!%p2802_p13)
}
  0x44   : > { %s2806_s26 = scalar_lea.vmem %s3317_s29, 64  ;;  %p2814_p6 = scmp.lt.s32.totalorder %s3317_s29, %s3317_s29 }
  0x45   : > { %p2807_p0 = scmp.ne.s32.totalorder %s3317_s29, %s2806_s26  ;;  %p2815_p8 = scmp.lt.s32.totalorder %s2806_s26, %s2806_s26 }
  0x47   : > { %p2809_p2 = pnand %p2807_p0, %p3329_p7  ;;  %p2816_p9 = por %p2815_p8, %p2814_p6 }
  0x49   : > { %p2810_p4 = pneg %p2809_p2 }
  0x4b   : > { %p2817_p10 = pnand %p2816_p9, %p2810_p4 }
  0x4d   : > { %2820 = shalt.err (!%p2817_p10)
}
  0x4e   : > { %2648 = dma.hbm_to_vmem [thread:$0]  (!%p3313_p5), %s3831_s4, 64, %s3317_s29, [#allocation10]  }
  0x4f   : > { %s3832_s5 = sld [smem:[#allocation37_spill]] }
  0x55   : > { %s2821_s16 = scalar_lea.hbm %s3832_s5, 8192 }
  0x56   : > { %p2822_p11 = scmp.ne.s32.totalorder %s3832_s5, %s2821_s16  ;;  %p2828_p0 = scmp.lt.u32.totalorder %s2821_s16, %s3832_s5 }
  0x58   : > { %p2824_p12 = pnand %p2822_p11, %p3329_p7 }
  0x5a   : > { %p2825_p13 = pneg %p2824_p12 }
  0x5c   : > { %p2830_p2 = pnand %p2828_p0, %p2825_p13 }
  0x5e   : > { %2833 = shalt.err (!%p2830_p2)
}
  0x5f   : > { %s2834_s26 = scalar_lea.vmem %s376_s12, 8192  ;;  %p2842_p9 = scmp.lt.s32.totalorder %s376_s12, %s376_s12 }
  0x60   : > { %p2835_p4 = scmp.ne.s32.totalorder %s376_s12, %s2834_s26  ;;  %p2843_p10 = scmp.lt.s32.totalorder %s2834_s26, %s2834_s26 }
  0x62   : > { %p2837_p6 = pnand %p2835_p4, %p3329_p7  ;;  %p2844_p1 = por %p2843_p10, %p2842_p9 }
  0x64   : > { %p2838_p8 = pneg %p2837_p6 }
  0x66   : > { %p2845_p3 = pnand %p2844_p1, %p2838_p8 }
  0x68   : > { %2848 = shalt.err (!%p2845_p3)
}
  0x69   : > { %2651 = dma.hbm_to_vmem [thread:$0]  (!%p3313_p5), %s3832_s5, 8192, %s376_s12, [#allocation13], %s3186_s14, %s3186_s14, %s3187_s15  }
  0x6a   : > { %s3188_s3 = smov [#allocation15]   ;;  %s3189_s24 = smov [#allocation18]  }
  0x6b   : > { %s399_s20 = sshll.u32 %s3188_s3, 4  ;;  %s427_s16 = sshll.u32 %s3189_s24, 4  ;;  %s400_s20 = int_to_ptr.vmem [resolvable:$true] %s399_s20  ;;  %s428_s16 = int_to_ptr.vmem [resolvable:$true] %s427_s16 }
  0x6c   : > { %s2849_s30 = scalar_lea.hbm %s3806_s7, 2048 }
  0x6d   : > { %p2850_p1 = scmp.ne.s32.totalorder %s3806_s7, %s2849_s30  ;;  %p2856_p12 = scmp.lt.u32.totalorder %s2849_s30, %s3806_s7 }
  0x6f   : > { %p2852_p3 = pnand %p2850_p1, %p3329_p7 }
  0x71   : > { %p2853_p11 = pneg %p2852_p3 }
  0x73   : > { %p2858_p13 = pnand %p2856_p12, %p2853_p11 }
  0x75   : > { %2861 = shalt.err (!%p2858_p13)
}
  0x76   : > { %s2862_s12 = scalar_lea.vmem %s400_s20, 2048  ;;  %p2870_p6 = scmp.lt.s32.totalorder %s400_s20, %s400_s20 }
  0x77   : > { %p2863_p0 = scmp.ne.s32.totalorder %s400_s20, %s2862_s12  ;;  %p2871_p8 = scmp.lt.s32.totalorder %s2862_s12, %s2862_s12 }
  0x79   : > { %p2865_p2 = pnand %p2863_p0, %p3329_p7  ;;  %p2872_p9 = por %p2871_p8, %p2870_p6 }
  0x7b   : > { %p2866_p4 = pneg %p2865_p2 }
  0x7d   : > { %p2873_p10 = pnand %p2872_p9, %p2866_p4 }
  0x7f   : > { %2876 = shalt.err (!%p2873_p10)
}
  0x80   : > { %2657 = dma.hbm_to_vmem [thread:$0]  (!%p3313_p5), %s3806_s7, 2048, %s400_s20, [#allocation16], %s3186_s14, %s3186_s14, %s3187_s15  }
  0x81   : > { %s2877_s25 = scalar_lea.hbm %s3808_s9, 512 }
  0x82   : > { %p2878_p1 = scmp.ne.s32.totalorder %s3808_s9, %s2877_s25  ;;  %p2884_p12 = scmp.lt.u32.totalorder %s2877_s25, %s3808_s9 }
  0x84   : > { %p2880_p3 = pnand %p2878_p1, %p3329_p7 }
  0x86   : > { %p2881_p11 = pneg %p2880_p3 }
  0x88   : > { %p2886_p13 = pnand %p2884_p12, %p2881_p11 }
  0x8a   : > { %2889 = shalt.err (!%p2886_p13)
}
  0x8b   : > { %s2890_s29 = scalar_lea.vmem %s428_s16, 512  ;;  %p2898_p6 = scmp.lt.s32.totalorder %s428_s16, %s428_s16 }
  0x8c   : > { %p2891_p0 = scmp.ne.s32.totalorder %s428_s16, %s2890_s29  ;;  %p2899_p8 = scmp.lt.s32.totalorder %s2890_s29, %s2890_s29 }
  0x8e   : > { %p2893_p2 = pnand %p2891_p0, %p3329_p7  ;;  %p2900_p9 = por %p2899_p8, %p2898_p6 }
  0x90   : > { %p2894_p4 = pneg %p2893_p2 }
  0x92   : > { %p2901_p10 = pnand %p2900_p9, %p2894_p4 }
  0x94   : > { %2904 = shalt.err (!%p2901_p10)
}
  0x95   : > { %2663 = dma.hbm_to_vmem [thread:$0]  (!%p3313_p5), %s3808_s9, 512, %s428_s16, [#allocation19]  }
  0x96   : > { %s3190_s20 = smov [#allocation8]   ;;  %s3191_s1 = smov [#allocation14]  }
  0x97   : > { %s354_s12 = sshll.u32 %s3190_s20, 4  ;;  %s389_s0 = sshll.u32 %s3191_s1, 4  ;;  %s355_s12 = int_to_ptr.vmem [resolvable:$true] %s354_s12  ;;  %s390_s0 = int_to_ptr.vmem [resolvable:$true] %s389_s0 }
  0x98   : > { %s3833_s2 = sld [smem:[#allocation34_spill]] }
  0x9e   : > { %s2905_s25 = scalar_lea.hbm %s3833_s2, 16 }
  0x9f   : > { %p2906_p1 = scmp.ne.s32.totalorder %s3833_s2, %s2905_s25  ;;  %p2912_p12 = scmp.lt.u32.totalorder %s2905_s25, %s3833_s2 }
  0xa1   : > { %p2908_p3 = pnand %p2906_p1, %p3329_p7 }
  0xa3   : > { %p2909_p11 = pneg %p2908_p3 }
  0xa5   : > { %p2914_p13 = pnand %p2912_p12, %p2909_p11 }
  0xa7   : > { %2917 = shalt.err (!%p2914_p13)
}
  0xa8   : > { %s2918_s16 = scalar_lea.vmem %s355_s12, 16  ;;  %s2925_s29 = scalar_lea.vmem %s355_s12, 32 }
  0xa9   : > { %p2919_p0 = scmp.ne.s32.totalorder %s355_s12, %s2918_s16  ;;  %p2926_p6 = scmp.lt.s32.totalorder %s355_s12, %s355_s12 }
  0xaa   : > { %p2927_p8 = scmp.lt.s32.totalorder %s2925_s29, %s2918_s16 }
  0xab   : > { %p2921_p2 = pnand %p2919_p0, %p3329_p7 }
  0xac   : > { %p2928_p9 = por %p2927_p8, %p2926_p6 }
  0xad   : > { %p2922_p4 = pneg %p2921_p2 }
  0xaf   : > { %p2929_p10 = pnand %p2928_p9, %p2922_p4 }
  0xb1   : > { %2932 = shalt.err (!%p2929_p10)
}
  0xb2   : > { %2645 = dma.hbm_to_vmem [thread:$0]  (!%p3313_p5), %s3833_s2, 16, %s355_s12, [#allocation7]  }
  0xb3   : > { %s2933_s3 = scalar_lea.hbm %s3805_s6, 16 }
  0xb4   : > { %p2934_p1 = scmp.ne.s32.totalorder %s3805_s6, %s2933_s3  ;;  %p2940_p12 = scmp.lt.u32.totalorder %s2933_s3, %s3805_s6 }
  0xb6   : > { %p2936_p3 = pnand %p2934_p1, %p3329_p7 }
  0xb8   : > { %p2937_p11 = pneg %p2936_p3 }
  0xba   : > { %p2942_p13 = pnand %p2940_p12, %p2937_p11 }
  0xbc   : > { %2945 = shalt.err (!%p2942_p13)
}
  0xbd   : > { %s2946_s13 = scalar_lea.vmem %s390_s0, 16  ;;  %s2953_s12 = scalar_lea.vmem %s390_s0, 32 }
  0xbe   : > { %p2947_p0 = scmp.ne.s32.totalorder %s390_s0, %s2946_s13  ;;  %p2954_p6 = scmp.lt.s32.totalorder %s390_s0, %s390_s0 }
  0xbf   : > { %p2955_p8 = scmp.lt.s32.totalorder %s2953_s12, %s2946_s13 }
  0xc0   : > { %p2949_p2 = pnand %p2947_p0, %p3329_p7 }
  0xc1   : > { %p2956_p9 = por %p2955_p8, %p2954_p6 }
  0xc2   : > { %p2950_p4 = pneg %p2949_p2 }
  0xc4   : > { %p2957_p10 = pnand %p2956_p9, %p2950_p4 }
  0xc6   : > { %2960 = shalt.err (!%p2957_p10)
}
  0xc7   : > { %2654 = dma.hbm_to_vmem [thread:$0]  (!%p3313_p5), %s3805_s6, 16, %s390_s0, [#allocation13]  }
  0xc8   : > { %s3192_s29 = smov [#allocation17]   ;;  %s3193_s15 = smov [#allocation20]  }
  0xc9   : > { %s413_s14 = sshll.u32 %s3192_s29, 4  ;;  %s440_s20 = sshll.u32 %s3193_s15, 4  ;;  %s414_s14 = int_to_ptr.vmem [resolvable:$true] %s413_s14  ;;  %s441_s20 = int_to_ptr.vmem [resolvable:$true] %s440_s20 }
  0xca   : > { %s2961_s24 = scalar_lea.hbm %s3807_s8, 16 }
  0xcb   : > { %p2962_p1 = scmp.ne.s32.totalorder %s3807_s8, %s2961_s24  ;;  %p2968_p12 = scmp.lt.u32.totalorder %s2961_s24, %s3807_s8 }
  0xcd   : > { %p2964_p3 = pnand %p2962_p1, %p3329_p7 }
  0xcf   : > { %p2965_p11 = pneg %p2964_p3 }
  0xd1   : > { %p2970_p13 = pnand %p2968_p12, %p2965_p11 }
  0xd3   : > { %2973 = shalt.err (!%p2970_p13)
}
  0xd4   : > { %s2974_s0 = scalar_lea.vmem %s414_s14, 16  ;;  %s2981_s12 = scalar_lea.vmem %s414_s14, 32 }
  0xd5   : > { %p2975_p0 = scmp.ne.s32.totalorder %s414_s14, %s2974_s0  ;;  %p2982_p6 = scmp.lt.s32.totalorder %s414_s14, %s414_s14 }
  0xd6   : > { %p2983_p8 = scmp.lt.s32.totalorder %s2981_s12, %s2974_s0 }
  0xd7   : > { %p2977_p2 = pnand %p2975_p0, %p3329_p7 }
  0xd8   : > { %p2984_p9 = por %p2983_p8, %p2982_p6 }
  0xd9   : > { %p2978_p4 = pneg %p2977_p2 }
  0xdb   : > { %p2985_p10 = pnand %p2984_p9, %p2978_p4 }
  0xdd   : > { %2988 = shalt.err (!%p2985_p10)
}
  0xde   : > { %2660 = dma.hbm_to_vmem [thread:$0]  (!%p3313_p5), %s3807_s8, 16, %s414_s14, [#allocation16]  }
  0xdf   : > { %s2989_s1 = scalar_lea.hbm %s3809_s10, 128 }
  0xe0   : > { %p2990_p1 = scmp.ne.s32.totalorder %s3809_s10, %s2989_s1  ;;  %p2996_p12 = scmp.lt.u32.totalorder %s2989_s1, %s3809_s10 }
  0xe2   : > { %p2992_p3 = pnand %p2990_p1, %p3329_p7 }
  0xe4   : > { %p2993_p11 = pneg %p2992_p3 }
  0xe6   : > { %p2998_p13 = pnand %p2996_p12, %p2993_p11 }
  0xe8   : > { %3001 = shalt.err (!%p2998_p13)
}
  0xe9   : > { %s3002_s30 = scalar_lea.vmem %s441_s20, 128  ;;  %p3010_p6 = scmp.lt.s32.totalorder %s441_s20, %s441_s20 }
  0xea   : > { %p3003_p0 = scmp.ne.s32.totalorder %s441_s20, %s3002_s30  ;;  %p3011_p8 = scmp.lt.s32.totalorder %s3002_s30, %s3002_s30 }
  0xec   : > { %p3005_p2 = pnand %p3003_p0, %p3329_p7  ;;  %p3012_p9 = por %p3011_p8, %p3010_p6 }
  0xee   : > { %p3006_p4 = pneg %p3005_p2 }
  0xf0   : > { %p3013_p10 = pnand %p3012_p9, %p3006_p4 }
  0xf2   : > { %3016 = shalt.err (!%p3013_p10)
}
  0xf3   : > { %2666 = dma.hbm_to_vmem [thread:$0]  (!%p3313_p5), %s3809_s10, 128, %s441_s20, [#allocation19]  }
  0xf4   : > { %s41_s11 = sadd.s32 1, %s3177_s21  ;;  %s53_s27 = sadd.s32 1, %s3169_s19 }
  0xf5   : > { %p42_p7 = scmp.ge.s32.totalorder %s41_s11, 25  ;;  %p60_p1 = scmp.ne.s32.totalorder %s3169_s19, %s3165_s18 }
  0xf6   : > { %p61_p3 = scmp.eq.s32.totalorder %s3181_s22, 0  ;;  %p66_p12 = scmp.ne.s32.totalorder %s3165_s18, %s3161_s17 }
  0xf7   : > { %s3860_s11 = smov (%p42_p7, %s41_s11), 0  ;;  %p2683_p13 = scmp.lt.s32.totalorder %s3181_s22, 25 }
  0xf8   : > { %p62_p11 = por %p61_p3, %p60_p1  ;;  %s48_s0 = ssub.s32 %s3177_s21, %s3860_s11 }
  0xf9   : > { %p51_p0 = scmp.eq.s32.totalorder %s48_s0, 0  ;;  %p3834_p2 = scmp.eq.s32.totalorder %s3298_s23, 0 }
  0xfa   : > { %s3528_s26 = sand.u32 1, %s3169_s19   ;;  %s2593_s20 = smul.u32 3840, %s3177_s21 }
  0xfb   : > { %p3523_p4 = por %p3834_p2, %p66_p12  ;;  %s2592_s29 = smul.u32 240, %s3528_s26 }
  0xfc   : > { %s3532_s16 = scalar_select %p51_p0, %s3169_s19, %s53_s27  }
  0xfd   : > { %s3836_s3 = sld [smem:[#allocation32_spill]]  ;;  %p3540_p5 = pnand %p2683_p13, %p62_p11 }
  0xfe   : > { %s455_s25 = scalar_lea.vmem [#allocation3], %s2592_s29  ;;  %s452_s30 = scalar_lea.sflag [#allocation4], %s3528_s26 }
  0xff   : > { %s464_s28 = sshll.u32 %s455_s25, 4  ;;  %p3019_p8 = pneg %p3540_p5  ;;  %s3544_s28 = int_to_ptr.vmem [resolvable:$true] %s464_s28 }
 0x103   : > { %s3538_s17 = scalar_lea.hbm %s3836_s3, %s2593_s20  ;;  %s3022_s0 = scalar_lea.hbm %s3836_s3, 96000 }
 0x104   : > { %s3017_s14 = scalar_lea.hbm %s3538_s17, 3840  ;;  %p3023_p7 = scmp.lt.u32.totalorder %s3538_s17, %s3836_s3 }
 0x105   : > { %p3018_p6 = scmp.ne.s32.totalorder %s3538_s17, %s3017_s14  ;;  %p3024_p1 = scmp.lt.u32.totalorder %s3022_s0, %s3017_s14 }
 0x106   : > { %p3026_p11 = scmp.lt.u32.totalorder %s3017_s14, %s3538_s17 }
 0x107   : > { %p3020_p9 = pnand %p3019_p8, %p3018_p6  ;;  %p3025_p3 = por %p3024_p1, %p3023_p7 }
 0x109   : > { %p3021_p10 = pneg %p3020_p9  ;;  %p3027_p12 = por %p3026_p11, %p3025_p3 }
 0x10b   : > { %p3028_p13 = pnand %p3027_p12, %p3021_p10 }
 0x10d   : > { %3031 = shalt.err (!%p3028_p13)
}
 0x10e   : > { %s3032_s29 = scalar_lea.vmem %s3544_s28, 3840  ;;  %s3194_s1 = smov [#allocation3]  }
 0x10f   : > { %p3033_p0 = scmp.ne.s32.totalorder %s3544_s28, %s3032_s29  ;;  %s3037_s25 = sshll.u32 %s3194_s1, 4  ;;  %s3038_s25 = int_to_ptr.vmem [resolvable:$false] %s3037_s25 }
 0x110   : > { %s3039_s13 = scalar_lea.vmem %s3038_s25, 7680  ;;  %p3040_p9 = scmp.lt.s32.totalorder %s3544_s28, %s3038_s25 }
 0x111   : > { %p3035_p2 = pnand %p3033_p0, %p3019_p8  ;;  %p3041_p7 = scmp.lt.s32.totalorder %s3039_s13, %s3032_s29 }
 0x113   : > { %p3036_p6 = pneg %p3035_p2  ;;  %p3042_p1 = por %p3041_p7, %p3040_p9 }
 0x115   : > { %p3043_p3 = pnand %p3042_p1, %p3036_p6 }
 0x117   : > { %3046 = shalt.err (!%p3043_p3)
}
 0x118   : > { %s3195_s14 = smov 1280   ;;  %s3196_s27 = smov 80  }
 0x119   : > { %2670 = dma.hbm_to_vmem [thread:$0]  (!%p3540_p5), %s3538_s17, 3840, %s3544_s28, %s452_s30, %s3195_s14, %s3195_s14, %s3196_s27  }
 0x11a   : > { %s474_s0 = sand.u32 1, %s3181_s22   ;;  %s1966_s20 = sshll.u32 %s3528_s26, 9 }
 0x11b   : > { %s1992_s15 = sshll.u32 %s3177_s21, 13  ;;  %s478_s29 = scalar_lea.vmem [#allocation9], %s1966_s20 }
 0x11c   : > { %s485_s1 = sshll.u32 %s478_s29, 4  ;;  %s3838_s2 = sld [smem:[#allocation35_spill]]  ;;  %s3582_s1 = int_to_ptr.vmem [resolvable:$true] %s485_s1 }
 0x11d   : > { %s3584_s4 = scalar_lea.sflag [#allocation10], %s474_s0 }
 0x122   : > { %s3580_s3 = scalar_lea.hbm %s3838_s2, %s1992_s15  ;;  %s3052_s28 = scalar_lea.hbm %s3838_s2, 204800 }
 0x123   : > { %s3047_s5 = scalar_lea.hbm %s3580_s3, 8192  ;;  %p3053_p13 = scmp.lt.u32.totalorder %s3580_s3, %s3838_s2 }
 0x124   : > { %p3048_p10 = scmp.ne.s32.totalorder %s3580_s3, %s3047_s5  ;;  %p3054_p0 = scmp.lt.u32.totalorder %s3052_s28, %s3047_s5 }
 0x125   : > { %p3056_p6 = scmp.lt.u32.totalorder %s3047_s5, %s3580_s3 }
 0x126   : > { %p3050_p11 = pnand %p3048_p10, %p3019_p8  ;;  %p3055_p2 = por %p3054_p0, %p3053_p13 }
 0x128   : > { %p3051_p12 = pneg %p3050_p11  ;;  %p3057_p9 = por %p3056_p6, %p3055_p2 }
 0x12a   : > { %p3058_p7 = pnand %p3057_p9, %p3051_p12 }
 0x12c   : > { %3061 = shalt.err (!%p3058_p7)
}
 0x12d   : > { %s3062_s27 = scalar_lea.vmem %s3582_s1, 8192  ;;  %s3197_s0 = smov [#allocation9]  }
 0x12e   : > { %p3063_p1 = scmp.ne.s32.totalorder %s3582_s1, %s3062_s27  ;;  %s3067_s20 = sshll.u32 %s3197_s0, 4  ;;  %s3068_s20 = int_to_ptr.vmem [resolvable:$false] %s3067_s20 }
 0x12f   : > { %s3069_s15 = scalar_lea.vmem %s3068_s20, 16384  ;;  %p3070_p11 = scmp.lt.s32.totalorder %s3582_s1, %s3068_s20 }
 0x130   : > { %p3065_p3 = pnand %p3063_p1, %p3019_p8  ;;  %p3071_p13 = scmp.lt.s32.totalorder %s3069_s15, %s3062_s27 }
 0x132   : > { %p3066_p10 = pneg %p3065_p3  ;;  %p3072_p0 = por %p3071_p13, %p3070_p11 }
 0x134   : > { %p3073_p2 = pnand %p3072_p0, %p3066_p10 }
 0x136   : > { %3076 = shalt.err (!%p3073_p2)
}
 0x137   : > { %s3198_s5 = smov 512   ;;  %s3199_s29 = smov 32  }
 0x138   : > { %2673 = dma.hbm_to_vmem [thread:$0]  (!%p3540_p5), %s3580_s3, 8192, %s3582_s1, %s3584_s4, %s3198_s5, %s3198_s5, %s3199_s29  }
 0x139   : > { %s3839_s25 = sld [smem:[#allocation31_spill]] }
 0x13f   : > { %p3840_p8 = scmp.ne.s32.totalorder %s3839_s25, 0 }
 0x140   : > { %s499_s13 = sand.u32 (!%p3840_p8), 1, %s3165_s18  }
 0x141   : > { %497 = sbr.rel (%p3840_p8) target bundleno = 1431 (0x597), region = 64  ;;  %s500_s17 = scalar_lea.sflag (!%p3840_p8), [#allocation4], %s499_s13 }
 0x142   : > { %s2594_s26 = smul.u32 (!%p3840_p8), 240, %s499_s13 }
 0x144   : > { %s3613_s28 = scalar_lea.vmem (!%p3840_p8), [#allocation3], %s2594_s26 }
 0x148   : > { %3128 = dma.done.wait (%p3523_p4), %s500_s17, 3840  }
 0x149   : > { %3130 = vsyncadd (%p3523_p4), %s500_s17, 4294963456  ;;  %p3841_p12 = scmp.eq.s32.totalorder %s3298_s23, 0 }
 0x14b   : > { %3132 = dma.done.wait (%p3841_p12), [#allocation7], 19216   ;;  %p3842_p5 = pmov %p3841_p12 }
 0x14c   : > { %s516_s4 = sand.u32 1, %s3298_s23   ;;  %s1972_s3 = sshll.u32 %s499_s13, 9 }
 0x14d   : > { %3134 = vsyncadd (%p3842_p5), [#allocation7], 4294948080  ;;  %s517_s24 = scalar_lea.sflag [#allocation10], %s516_s4  ;;  %s3624_s1 = scalar_lea.vmem [#allocation9], %s1972_s3 }
 0x14e   : > { %3136 = dma.done.wait (%p3523_p4), %s517_s24, 8192  }
 0x14f   : > { %3138 = vsyncadd (%p3523_p4), %s517_s24, 4294959104  ;;  %p3843_p6 = pmov %p3842_p5 }
 0x150   : > { %p3844_p9 = pmov %p3842_p5 }
 0x151   : > { %3140 = dma.done.wait (%p3843_p6), [#allocation10], 64  }
 0x152   : > { %3142 = vsyncadd (%p3844_p9), [#allocation10], 4294967232  ;;  %p3845_p7 = pmov %p3842_p5 }
 0x153   : > { %p3846_p1 = pmov %p3842_p5 }
 0x154   : > { %3144 = dma.done.wait (%p3845_p7), [#allocation13], 8208  }
 0x155   : > { %3146 = vsyncadd (%p3846_p1), [#allocation13], 4294959088  ;;  %p3847_p3 = pmov %p3846_p1 }
 0x156   : > { %p3848_p10 = pmov %p3846_p1 }
 0x157   : > { %3148 = dma.done.wait (%p3847_p3), [#allocation16], 2064  }
 0x158   : > { %3150 = vsyncadd (%p3848_p10), [#allocation16], 4294965232  ;;  %p3849_p4 = pmov %p3846_p1 }
 0x159   : > { %p3850_p11 = pmov %p3846_p1 }
 0x15a   : > { %3152 = dma.done.wait (%p3849_p4), [#allocation19], 640  }
 0x15b   : > { %3154 = vsyncadd (%p3850_p11), [#allocation19], 4294966656  ;;  %s3851_s12 = sld [smem:[#allocation30_spill]] }
 0x161   : > { %p1980_p13 = scmp.ne.s32.totalorder %s3851_s12, 0 }
 0x162   : > { %v3200_v0 = vmov (!%p1980_p13), 0.0  }
 0x163   : > { %590 = sbr.rel (%p1980_p13) target bundleno = 362 (0x16a), region = 112  ;;  %591 = vst [vmem:[#allocation2] sm:$0xff] (!%p1980_p13), %v3200_v0  ;;  %592 = vst [vmem:[#allocation2 + $0x8] sm:$0xff] (!%p1980_p13), %v3200_v0 }
 0x164   : > { %593 = vst [vmem:[#allocation2 + $0x10] sm:$0xff] (!%p1980_p13), %v3200_v0  ;;  %594 = vst [vmem:[#allocation2 + $0x18] sm:$0xff] (!%p1980_p13), %v3200_v0 }
 0x16a PF: > { %v641_v1 = vld [vmem:[#allocation6 + $0x80] sm:$0xff]  ;;  %v642_v2 = vld [vmem:[#allocation6 + $0x88] sm:$0xff]  ;;  %v643_v12 = vld [vmem:[#allocation6 + $0x90] sm:$0xff]  ;;  %vm775_vm0 = vcmask 392192   ;;  %s3852_s30 = sld [smem:[#allocation30_spill]] }
 0x16b   : > { %v673_v3 = vld [vmem:[#allocation6 + $0x180] sm:$0xff]  ;;  %v2279_v4 = vpack.c.bf16 %v642_v2, %v641_v1  ;;  %v674_v5 = vld [vmem:[#allocation6 + $0x188] sm:$0xff]  ;;  %v644_v14 = vld [vmem:[#allocation6 + $0x98] sm:$0xff] }
 0x16c   : > { %v625_v6 = vld [vmem:[#allocation6] sm:$0xff]  ;;  %v626_v7 = vld [vmem:[#allocation6 + $0x8] sm:$0xff]  ;;  %v2311_v8 = vpack.c.bf16 %v674_v5, %v673_v3  ;;  %v675_v15 = vld [vmem:[#allocation6 + $0x190] sm:$0xff]  ;;  %v2283_v17 = vpack.c.bf16 %v644_v14, %v643_v12 }
 0x16d   : > { %v2281_v9 = vpack.c.bf16 %v626_v7, %v625_v6  ;;  %v657_v10 = vld [vmem:[#allocation6 + $0x100] sm:$0xff]  ;;  %v658_v11 = vld [vmem:[#allocation6 + $0x108] sm:$0xff]  ;;  %2280 = vmatprep.subr.bf16.mxu0 %v2279_v4  ;;  %v676_v16 = vld [vmem:[#allocation6 + $0x198] sm:$0xff] }
 0x16e   : > { %v2313_v13 = vpack.c.bf16 %v658_v11, %v657_v10  ;;  %2312 = vmatprep.subr.bf16.mxu1 %v2311_v8  ;;  %v2315_v18 = vpack.c.bf16 %v676_v16, %v675_v15  ;;  %v627_v19 = vld [vmem:[#allocation6 + $0x10] sm:$0xff]  ;;  %v628_v20 = vld [vmem:[#allocation6 + $0x18] sm:$0xff]  ;;  %v645_v24 = vld [vmem:[#allocation6 + $0xa0] sm:$0xff] }
 0x16f   : > { %2282 = vmatpush3.bf16.msra.mxu0 %v2281_v9  ;;  %v659_v21 = vld [vmem:[#allocation6 + $0x110] sm:$0xff]  ;;  %v2285_v22 = vpack.c.bf16 %v628_v20, %v627_v19  ;;  %v660_v23 = vld [vmem:[#allocation6 + $0x118] sm:$0xff]  ;;  %v646_v25 = vld [vmem:[#allocation6 + $0xa8] sm:$0xff] }
 0x170   : > { %2314 = vmatpush3.bf16.msra.mxu1 %v2313_v13  ;;  %2284 = vmatprep.subr.bf16.mxu0 %v2283_v17  ;;  %v2317_v26 = vpack.c.bf16 %v660_v23, %v659_v21  ;;  %v2287_v27 = vpack.c.bf16 %v646_v25, %v645_v24  ;;  %v677_v28 = vld [vmem:[#allocation6 + $0x1a0] sm:$0xff]  ;;  %v678_v29 = vld [vmem:[#allocation6 + $0x1a8] sm:$0xff]  ;;  %v647_v36 = vld [vmem:[#allocation6 + $0xb0] sm:$0xff]  ;;  %p1985_p0 = scmp.ne.s32.totalorder %s3852_s30, 24 }
 0x171   : > { %2316 = vmatprep.subr.bf16.mxu1 %v2315_v18  ;;  %v629_v30 = vld [vmem:[#allocation6 + $0x20] sm:$0xff]  ;;  %v2319_v31 = vpack.c.bf16 %v678_v29, %v677_v28  ;;  %v630_v32 = vld [vmem:[#allocation6 + $0x28] sm:$0xff]  ;;  %v648_v37 = vld [vmem:[#allocation6 + $0xb8] sm:$0xff]  ;;  %vm3204_vm1 = vmmov (!%p1985_p0), 0  }
 0x172   : > { %v661_v33 = vld [vmem:[#allocation6 + $0x120] sm:$0xff]  ;;  %v662_v34 = vld [vmem:[#allocation6 + $0x128] sm:$0xff]  ;;  %v2289_v35 = vpack.c.bf16 %v630_v32, %v629_v30  ;;  %v679_v38 = vld [vmem:[#allocation6 + $0x1b0] sm:$0xff]  ;;  %v2291_v40 = vpack.c.bf16 %v648_v37, %v647_v36 }
 0x173   : > { %2286 = vmatpush3.bf16.msra.mxu0 %v2285_v22  ;;  %v2321_v39 = vpack.c.bf16 %v662_v34, %v661_v33  ;;  %v680_v41 = vld [vmem:[#allocation6 + $0x1b8] sm:$0xff]  ;;  %v631_v42 = vld [vmem:[#allocation6 + $0x30] sm:$0xff]  ;;  %v649_v47 = vld [vmem:[#allocation6 + $0xc0] sm:$0xff] }
 0x174   : > { %2318 = vmatpush3.bf16.msra.mxu1 %v2317_v26  ;;  %2288 = vmatprep.subr.bf16.mxu0 %v2287_v27  ;;  %v632_v43 = vld [vmem:[#allocation6 + $0x38] sm:$0xff]  ;;  %v2323_v44 = vpack.c.bf16 %v680_v41, %v679_v38  ;;  %v663_v45 = vld [vmem:[#allocation6 + $0x130] sm:$0xff]  ;;  %v650_v48 = vld [vmem:[#allocation6 + $0xc8] sm:$0xff] }
 0x175   : > { %2320 = vmatprep.subr.bf16.mxu1 %v2319_v31  ;;  %v664_v46 = vld [vmem:[#allocation6 + $0x138] sm:$0xff]  ;;  %v681_v49 = vld [vmem:[#allocation6 + $0x1c0] sm:$0xff]  ;;  %v682_v50 = vld [vmem:[#allocation6 + $0x1c8] sm:$0xff]  ;;  %v2293_v51 = vpack.c.bf16 %v632_v43, %v631_v42  ;;  %v2295_v53 = vpack.c.bf16 %v650_v48, %v649_v47 }
 0x176   : > { %v2325_v52 = vpack.c.bf16 %v664_v46, %v663_v45  ;;  %v633_v54 = vld [vmem:[#allocation6 + $0x40] sm:$0xff]  ;;  %v634_v55 = vld [vmem:[#allocation6 + $0x48] sm:$0xff]  ;;  %v2327_v57 = vpack.c.bf16 %v682_v50, %v681_v49  ;;  %v651_v59 = vld [vmem:[#allocation6 + $0xd0] sm:$0xff] }
 0x177   : > { %2290 = vmatpush3.bf16.msra.mxu0 %v2289_v35  ;;  %v665_v56 = vld [vmem:[#allocation6 + $0x140] sm:$0xff]  ;;  %v666_v58 = vld [vmem:[#allocation6 + $0x148] sm:$0xff]  ;;  %v652_v60 = vld [vmem:[#allocation6 + $0xd8] sm:$0xff]  ;;  %v2297_v63 = vpack.c.bf16 %v634_v55, %v633_v54 }
 0x178   : > { %2322 = vmatpush3.bf16.msra.mxu1 %v2321_v39  ;;  %2292 = vmatprep.subr.bf16.mxu0 %v2291_v40  ;;  %v683_v61 = vld [vmem:[#allocation6 + $0x1d0] sm:$0xff]  ;;  %v684_v62 = vld [vmem:[#allocation6 + $0x1d8] sm:$0xff]  ;;  %v2329_v0 = vpack.c.bf16 %v666_v58, %v665_v56  ;;  %v2299_v1 = vpack.c.bf16 %v652_v60, %v651_v59  ;;  %v653_v7 = vld [vmem:[#allocation6 + $0xe0] sm:$0xff] }
 0x179   : > { %2324 = vmatprep.subr.bf16.mxu1 %v2323_v44  ;;  %v635_v2 = vld [vmem:[#allocation6 + $0x50] sm:$0xff]  ;;  %v636_v3 = vld [vmem:[#allocation6 + $0x58] sm:$0xff]  ;;  %v2331_v5 = vpack.c.bf16 %v684_v62, %v683_v61  ;;  %v654_v8 = vld [vmem:[#allocation6 + $0xe8] sm:$0xff] }
 0x17a   : > { %v667_v4 = vld [vmem:[#allocation6 + $0x150] sm:$0xff]  ;;  %v668_v6 = vld [vmem:[#allocation6 + $0x158] sm:$0xff]  ;;  %v685_v9 = vld [vmem:[#allocation6 + $0x1e0] sm:$0xff]  ;;  %v2301_v11 = vpack.c.bf16 %v636_v3, %v635_v2  ;;  %v2303_v15 = vpack.c.bf16 %v654_v8, %v653_v7 }
 0x17b   : > { %2294 = vmatpush3.bf16.msra.mxu0 %v2293_v51  ;;  %v686_v10 = vld [vmem:[#allocation6 + $0x1e8] sm:$0xff]  ;;  %v637_v12 = vld [vmem:[#allocation6 + $0x60] sm:$0xff]  ;;  %v2333_v14 = vpack.c.bf16 %v668_v6, %v667_v4  ;;  %v655_v21 = vld [vmem:[#allocation6 + $0xf0] sm:$0xff] }
 0x17c   : > { %2326 = vmatpush3.bf16.msra.mxu1 %v2325_v52  ;;  %2296 = vmatprep.subr.bf16.mxu0 %v2295_v53  ;;  %v638_v13 = vld [vmem:[#allocation6 + $0x68] sm:$0xff]  ;;  %v669_v16 = vld [vmem:[#allocation6 + $0x160] sm:$0xff]  ;;  %v2335_v19 = vpack.c.bf16 %v686_v10, %v685_v9  ;;  %v656_v22 = vld [vmem:[#allocation6 + $0xf8] sm:$0xff] }
 0x17d   : > { %2328 = vmatprep.subr.bf16.mxu1 %v2327_v57  ;;  %v596_v17 = vld [vmem:[%s3613_s28 + $0x8] sm:$0xff]  ;;  %v598_v18 = vld [vmem:[%s3613_s28 + $0x18] sm:$0xff]  ;;  %v687_v23 = vld [vmem:[#allocation6 + $0x1f0] sm:$0xff]  ;;  %v2305_v25 = vpack.c.bf16 %v638_v13, %v637_v12  ;;  %v2307_v27 = vpack.c.bf16 %v656_v22, %v655_v21 }
 0x17e   : > { %v670_v20 = vld [vmem:[#allocation6 + $0x168] sm:$0xff]  ;;  %849 = vmatprep.mubr.f32.mxu0 %v596_v17  ;;  %v688_v24 = vld [vmem:[#allocation6 + $0x1f8] sm:$0xff]  ;;  %929 = vmatprep.mubr.f32.mxu1 %v598_v18  ;;  %v639_v28 = vld [vmem:[#allocation6 + $0x70] sm:$0xff] }
 0x17f   : > { %2298 = vmatpush3.bf16.msra.mxu0 %v2297_v63  ;;  %v2337_v26 = vpack.c.bf16 %v670_v20, %v669_v16  ;;  %v640_v29 = vld [vmem:[#allocation6 + $0x78] sm:$0xff]  ;;  %v671_v30 = vld [vmem:[#allocation6 + $0x170] sm:$0xff]  ;;  %v2339_v31 = vpack.c.bf16 %v688_v24, %v687_v23  ;;  %v705_v33 = vld [vmem:[#allocation6 + $0x280] sm:$0xff] }
 0x180   : > { %2330 = vmatpush3.bf16.msra.mxu1 %v2329_v0  ;;  %2300 = vmatprep.subr.bf16.mxu0 %v2299_v1  ;;  %v672_v32 = vld [vmem:[#allocation6 + $0x178] sm:$0xff]  ;;  %v706_v34 = vld [vmem:[#allocation6 + $0x288] sm:$0xff]  ;;  %v737_v35 = vld [vmem:[#allocation6 + $0x380] sm:$0xff]  ;;  %v2309_v37 = vpack.c.bf16 %v640_v29, %v639_v28 }
 0x181   : > { %2332 = vmatprep.subr.bf16.mxu1 %v2331_v5  ;;  %v738_v36 = vld [vmem:[#allocation6 + $0x388] sm:$0xff]  ;;  %v2341_v38 = vpack.c.bf16 %v672_v32, %v671_v30  ;;  %v2343_v39 = vpack.c.bf16 %v706_v34, %v705_v33  ;;  %v689_v40 = vld [vmem:[#allocation6 + $0x200] sm:$0xff]  ;;  %v707_v45 = vld [vmem:[#allocation6 + $0x290] sm:$0xff] }
 0x182   : > { %v690_v41 = vld [vmem:[#allocation6 + $0x208] sm:$0xff]  ;;  %v721_v42 = vld [vmem:[#allocation6 + $0x300] sm:$0xff]  ;;  %v2375_v43 = vpack.c.bf16 %v738_v36, %v737_v35  ;;  %v708_v46 = vld [vmem:[#allocation6 + $0x298] sm:$0xff] }
 0x183   : > { %2302 = vmatpush3.bf16.msra.mxu0 %v2301_v11  ;;  %v722_v44 = vld [vmem:[#allocation6 + $0x308] sm:$0xff]  ;;  %v739_v47 = vld [vmem:[#allocation6 + $0x390] sm:$0xff]  ;;  %v740_v48 = vld [vmem:[#allocation6 + $0x398] sm:$0xff]  ;;  %v2345_v51 = vpack.c.bf16 %v690_v41, %v689_v40  ;;  %v2347_v53 = vpack.c.bf16 %v708_v46, %v707_v45 }
 0x184   : > { %2334 = vmatpush3.bf16.msra.mxu1 %v2333_v14  ;;  %2304 = vmatprep.subr.bf16.mxu0 %v2303_v15  ;;  %v595_v49 = vld [vmem:[%s3613_s28] sm:$0xff]  ;;  %v597_v50 = vld [vmem:[%s3613_s28 + $0x10] sm:$0xff]  ;;  %v2377_v52 = vpack.c.bf16 %v722_v44, %v721_v42  ;;  %v692_v55 = vld [vmem:[#allocation6 + $0x218] sm:$0xff]  ;;  %v2379_v57 = vpack.c.bf16 %v740_v48, %v739_v47 }
 0x185   : > { %2336 = vmatprep.subr.bf16.mxu1 %v2335_v19  ;;  %v691_v54 = vld [vmem:[#allocation6 + $0x210] sm:$0xff]  ;;  %v724_v58 = vld [vmem:[#allocation6 + $0x318] sm:$0xff]  ;;  %v709_v59 = vld [vmem:[#allocation6 + $0x2a0] sm:$0xff] }
 0x186   : > { %v723_v56 = vld [vmem:[#allocation6 + $0x310] sm:$0xff]  ;;  %v710_v60 = vld [vmem:[#allocation6 + $0x2a8] sm:$0xff]  ;;  %v741_v61 = vld [vmem:[#allocation6 + $0x3a0] sm:$0xff]  ;;  %v2349_v63 = vpack.c.bf16 %v692_v55, %v691_v54 }
 0x187   : > { %2306 = vmatpush3.bf16.msra.mxu0 %v2305_v25  ;;  %v742_v62 = vld [vmem:[#allocation6 + $0x3a8] sm:$0xff]  ;;  %v693_v0 = vld [vmem:[#allocation6 + $0x220] sm:$0xff]  ;;  %v2381_v3 = vpack.c.bf16 %v724_v58, %v723_v56  ;;  %v2351_v4 = vpack.c.bf16 %v710_v60, %v709_v59  ;;  %v711_v6 = vld [vmem:[#allocation6 + $0x2b0] sm:$0xff] }
 0x188   : > { %2338 = vmatpush3.bf16.msra.mxu1 %v2337_v26  ;;  %2308 = vmatprep.subr.bf16.mxu0 %v2307_v27  ;;  %v694_v1 = vld [vmem:[#allocation6 + $0x228] sm:$0xff]  ;;  %v725_v2 = vld [vmem:[#allocation6 + $0x320] sm:$0xff]  ;;  %v712_v7 = vld [vmem:[#allocation6 + $0x2b8] sm:$0xff]  ;;  %v2383_v8 = vpack.c.bf16 %v742_v62, %v741_v61 }
 0x189   : > { %2340 = vmatprep.subr.bf16.mxu1 %v2339_v31  ;;  %v726_v5 = vld [vmem:[#allocation6 + $0x328] sm:$0xff]  ;;  %v743_v9 = vld [vmem:[#allocation6 + $0x3b0] sm:$0xff]  ;;  %v744_v12 = vld [vmem:[#allocation6 + $0x3b8] sm:$0xff]  ;;  %v2353_v15 = vpack.c.bf16 %v694_v1, %v693_v0  ;;  %v2355_v20 = vpack.c.bf16 %v712_v7, %v711_v6 }
 0x18a   : > { %v606_v10 = vld [vmem:[%s3613_s28 + $0x58] sm:$0xff]  ;;  %v608_v11 = vld [vmem:[%s3613_s28 + $0x68] sm:$0xff]  ;;  %v605_v13 = vld [vmem:[%s3613_s28 + $0x50] sm:$0xff]  ;;  %v2385_v19 = vpack.c.bf16 %v726_v5, %v725_v2  ;;  %v2387_v24 = vpack.c.bf16 %v744_v12, %v743_v9 }
 0x18b   : > { %2310 = vmatpush3.bf16.msra.mxu0 %v2309_v37  ;;  %v607_v14 = vld [vmem:[%s3613_s28 + $0x60] sm:$0xff]  ;;  %v696_v17 = vld [vmem:[#allocation6 + $0x238] sm:$0xff]  ;;  %v714_v23 = vld [vmem:[#allocation6 + $0x2c8] sm:$0xff] }
 0x18c   : > { %2342 = vmatpush3.bf16.msra.mxu1 %v2341_v38  ;;  %2344 = vmatprep.subr.bf16.mxu0 %v2343_v39  ;;  %v695_v16 = vld [vmem:[#allocation6 + $0x230] sm:$0xff]  ;;  %v728_v21 = vld [vmem:[#allocation6 + $0x338] sm:$0xff]  ;;  %v713_v22 = vld [vmem:[#allocation6 + $0x2c0] sm:$0xff] }
 0x18d   : > { %2376 = vmatprep.subr.bf16.mxu1 %v2375_v43  ;;  %v727_v18 = vld [vmem:[#allocation6 + $0x330] sm:$0xff]  ;;  %v745_v25 = vld [vmem:[#allocation6 + $0x3c0] sm:$0xff]  ;;  %v616_v26 = vld [vmem:[%s3613_s28 + $0xa8] sm:$0xff]  ;;  %v2357_v31 = vpack.c.bf16 %v696_v17, %v695_v16  ;;  %v2359_v34 = vpack.c.bf16 %v714_v23, %v713_v22 }
 0x18e   : > { %850 = vmatmul.mubr.f32.vlgmr.msra.gmra.mrb[0].mxu0 %v595_v49  ;;  %v618_v27 = vld [vmem:[%s3613_s28 + $0xb8] sm:$0xff]  ;;  %v615_v29 = vld [vmem:[%s3613_s28 + $0xa0] sm:$0xff]  ;;  %v617_v30 = vld [vmem:[%s3613_s28 + $0xb0] sm:$0xff]  ;;  %v2389_v33 = vpack.c.bf16 %v728_v21, %v727_v18 }
 0x18f   : > { %930 = vmatmul.mubr.f32.vlgmr.msra.gmra.mrb[0].mxu1 %v597_v50  ;;  %2346 = vmatpush3.bf16.msra.mxu0 %v2345_v51  ;;  %v746_v28 = vld [vmem:[#allocation6 + $0x3c8] sm:$0xff]  ;;  %v697_v32 = vld [vmem:[#allocation6 + $0x240] sm:$0xff]  ;;  %v715_v39 = vld [vmem:[#allocation6 + $0x2d0] sm:$0xff] }
 0x190   : > { %2378 = vmatpush3.bf16.msra.mxu1 %v2377_v52  ;;  %2348 = vmatprep.subr.bf16.mxu0 %v2347_v53  ;;  %v698_v35 = vld [vmem:[#allocation6 + $0x248] sm:$0xff]  ;;  %v729_v36 = vld [vmem:[#allocation6 + $0x340] sm:$0xff]  ;;  %v2391_v38 = vpack.c.bf16 %v746_v28, %v745_v25  ;;  %v716_v40 = vld [vmem:[#allocation6 + $0x2d8] sm:$0xff] }
 0x191   : > { %2380 = vmatprep.subr.bf16.mxu1 %v2379_v57  ;;  %854 = vmatprep.mubr.f32.mxu0 %v606_v10  ;;  %v730_v37 = vld [vmem:[#allocation6 + $0x348] sm:$0xff]  ;;  %v747_v42 = vld [vmem:[#allocation6 + $0x3d0] sm:$0xff]  ;;  %v748_v43 = vld [vmem:[#allocation6 + $0x3d8] sm:$0xff]  ;;  %v2361_v45 = vpack.c.bf16 %v698_v35, %v697_v32  ;;  %v2363_v47 = vpack.c.bf16 %v716_v40, %v715_v39 }
 0x192   : > { %934 = vmatprep.mubr.f32.mxu1 %v608_v11  ;;  %855 = vmatmul.mubr.f32.gmra.mrb[2].mxu0 %v605_v13  ;;  %v600_v41 = vld [vmem:[%s3613_s28 + $0x28] sm:$0xff]  ;;  %v602_v44 = vld [vmem:[%s3613_s28 + $0x38] sm:$0xff]  ;;  %v2393_v46 = vpack.c.bf16 %v730_v37, %v729_v36  ;;  %v699_v48 = vld [vmem:[#allocation6 + $0x250] sm:$0xff]  ;;  %v2395_v51 = vpack.c.bf16 %v748_v43, %v747_v42 }
 0x193   : > { %2350 = vmatpush3.bf16.msra.mxu0 %v2349_v63  ;;  %935 = vmatmul.mubr.f32.gmra.mrb[2].mxu1 %v607_v14  ;;  %v700_v49 = vld [vmem:[#allocation6 + $0x258] sm:$0xff]  ;;  %v731_v50 = vld [vmem:[#allocation6 + $0x350] sm:$0xff]  ;;  %v717_v53 = vld [vmem:[#allocation6 + $0x2e0] sm:$0xff] }
 0x194   : > { %2382 = vmatpush3.bf16.msra.mxu1 %v2381_v3  ;;  %2352 = vmatprep.subr.bf16.mxu0 %v2351_v4  ;;  %v732_v52 = vld [vmem:[#allocation6 + $0x358] sm:$0xff]  ;;  %v718_v54 = vld [vmem:[#allocation6 + $0x2e8] sm:$0xff]  ;;  %v749_v55 = vld [vmem:[#allocation6 + $0x3e0] sm:$0xff]  ;;  %v2365_v57 = vpack.c.bf16 %v700_v49, %v699_v48 }
 0x195   : > { %2384 = vmatprep.subr.bf16.mxu1 %v2383_v8  ;;  %859 = vmatprep.mubr.f32.mxu0 %v616_v26  ;;  %v750_v56 = vld [vmem:[#allocation6 + $0x3e8] sm:$0xff]  ;;  %v2397_v58 = vpack.c.bf16 %v732_v52, %v731_v50  ;;  %v2367_v59 = vpack.c.bf16 %v718_v54, %v717_v53  ;;  %v701_v60 = vld [vmem:[#allocation6 + $0x260] sm:$0xff]  ;;  %v719_v1 = vld [vmem:[#allocation6 + $0x2f0] sm:$0xff] }
 0x196   : > { %939 = vmatprep.mubr.f32.mxu1 %v618_v27  ;;  %860 = vmatmul.mubr.f32.gmra.mrb[4].mxu0 %v615_v29  ;;  %v702_v61 = vld [vmem:[#allocation6 + $0x268] sm:$0xff]  ;;  %v733_v62 = vld [vmem:[#allocation6 + $0x360] sm:$0xff]  ;;  %v2399_v63 = vpack.c.bf16 %v750_v56, %v749_v55  ;;  %v720_v2 = vld [vmem:[#allocation6 + $0x2f8] sm:$0xff] }
 0x197   : > { %2354 = vmatpush3.bf16.msra.mxu0 %v2353_v15  ;;  %940 = vmatmul.mubr.f32.gmra.mrb[4].mxu1 %v617_v30  ;;  %v734_v0 = vld [vmem:[#allocation6 + $0x368] sm:$0xff]  ;;  %v751_v3 = vld [vmem:[#allocation6 + $0x3f0] sm:$0xff]  ;;  %v752_v4 = vld [vmem:[#allocation6 + $0x3f8] sm:$0xff]  ;;  %v2369_v5 = vpack.c.bf16 %v702_v61, %v701_v60  ;;  %v2371_v7 = vpack.c.bf16 %v720_v2, %v719_v1 }
 0x198   : > { %2386 = vmatpush3.bf16.msra.mxu1 %v2385_v19  ;;  %2356 = vmatprep.subr.bf16.mxu0 %v2355_v20  ;;  %v2401_v6 = vpack.c.bf16 %v734_v0, %v733_v62  ;;  %v703_v8 = vld [vmem:[#allocation6 + $0x270] sm:$0xff]  ;;  %v704_v9 = vld [vmem:[#allocation6 + $0x278] sm:$0xff]  ;;  %v2403_v10 = vpack.c.bf16 %v752_v4, %v751_v3  ;;  %v753_v15 = vld [vmem:[#allocation6 + $0x400] sm:$0xff]  ;;  %v3201_v19 = vmov 0.0|0.0  }
 0x199   : > { %2388 = vmatprep.subr.bf16.mxu1 %v2387_v24  ;;  %1009 = vmatprep.mubr.f32.mxu0 %v600_v41  ;;  %v735_v11 = vld [vmem:[#allocation6 + $0x370] sm:$0xff]  ;;  %v736_v12 = vld [vmem:[#allocation6 + $0x378] sm:$0xff]  ;;  %v2373_v13 = vpack.c.bf16 %v704_v9, %v703_v8  ;;  %v754_v16 = vld [vmem:[#allocation6 + $0x408] sm:$0xff] }
 0x19a   : > { %1089 = vmatprep.mubr.f32.mxu1 %v602_v44  ;;  %v2405_v14 = vpack.c.bf16 %v736_v12, %v735_v11  ;;  %v599_v17 = vld [vmem:[%s3613_s28 + $0x20] sm:$0xff]  ;;  %v2408_v18 = vpack.c.bf16 %v754_v16, %v753_v15  ;;  %v601_v20 = vld [vmem:[%s3613_s28 + $0x30] sm:$0xff]  ;;  %v756_v22 = vld [vmem:[#allocation6 + $0x418] sm:$0xff] }
 0x19b   : > { %2358 = vmatpush3.bf16.msra.mxu0 %v2357_v31  ;;  %v755_v21 = vld [vmem:[#allocation6 + $0x410] sm:$0xff]  ;;  %v610_v23 = vld [vmem:[%s3613_s28 + $0x78] sm:$0xff]  ;;  %v612_v24 = vld [vmem:[%s3613_s28 + $0x88] sm:$0xff] }
 0x19c   : > { %2390 = vmatpush3.bf16.msra.mxu1 %v2389_v33  ;;  %2360 = vmatprep.subr.bf16.mxu0 %v2359_v34  ;;  %v609_v25 = vld [vmem:[%s3613_s28 + $0x70] sm:$0xff]  ;;  %v2411_v26 = vpack.c.bf16 %v756_v22, %v755_v21  ;;  %v611_v27 = vld [vmem:[%s3613_s28 + $0x80] sm:$0xff]  ;;  %v758_v29 = vld [vmem:[#allocation6 + $0x428] sm:$0xff] }
 0x19d   : > { %2392 = vmatprep.subr.bf16.mxu1 %v2391_v38  ;;  %v757_v28 = vld [vmem:[#allocation6 + $0x420] sm:$0xff]  ;;  %v620_v30 = vld [vmem:[%s3613_s28 + $0xc8] sm:$0xff]  ;;  %v622_v31 = vld [vmem:[%s3613_s28 + $0xd8] sm:$0xff] }
 0x19e   : > { %v619_v32 = vld [vmem:[%s3613_s28 + $0xc0] sm:$0xff]  ;;  %v2414_v33 = vpack.c.bf16 %v758_v29, %v757_v28  ;;  %v621_v34 = vld [vmem:[%s3613_s28 + $0xd0] sm:$0xff]  ;;  %v760_v36 = vld [vmem:[#allocation6 + $0x438] sm:$0xff] }
 0x19f   : > { %2362 = vmatpush3.bf16.msra.mxu0 %v2361_v45  ;;  %v759_v35 = vld [vmem:[#allocation6 + $0x430] sm:$0xff]  ;;  %v604_v37 = vld [vmem:[%s3613_s28 + $0x48] sm:$0xff]  ;;  %v761_v39 = vld [vmem:[#allocation6 + $0x440] sm:$0xff] }
 0x1a0   : > { %2394 = vmatpush3.bf16.msra.mxu1 %v2393_v46  ;;  %2364 = vmatprep.subr.bf16.mxu0 %v2363_v47  ;;  %v2417_v38 = vpack.c.bf16 %v760_v36, %v759_v35  ;;  %v762_v40 = vld [vmem:[#allocation6 + $0x448] sm:$0xff]  ;;  %v763_v42 = vld [vmem:[#allocation6 + $0x450] sm:$0xff]  ;;  %v764_v43 = vld [vmem:[#allocation6 + $0x458] sm:$0xff] }
 0x1a1   : > { %2396 = vmatprep.subr.bf16.mxu1 %v2395_v51  ;;  %v2420_v41 = vpack.c.bf16 %v762_v40, %v761_v39  ;;  %v2423_v44 = vpack.c.bf16 %v764_v43, %v763_v42  ;;  %v765_v45 = vld [vmem:[#allocation6 + $0x460] sm:$0xff]  ;;  %v766_v46 = vld [vmem:[#allocation6 + $0x468] sm:$0xff]  ;;  %v767_v48 = vld [vmem:[#allocation6 + $0x470] sm:$0xff] }
 0x1a2   : > { %v2426_v47 = vpack.c.bf16 %v766_v46, %v765_v45  ;;  %v768_v49 = vld [vmem:[#allocation6 + $0x478] sm:$0xff]  ;;  %v769_v51 = vld [vmem:[#allocation6 + $0x480] sm:$0xff]  ;;  %v770_v52 = vld [vmem:[#allocation6 + $0x488] sm:$0xff] }
 0x1a3   : > { %2366 = vmatpush3.bf16.msra.mxu0 %v2365_v57  ;;  %v2429_v50 = vpack.c.bf16 %v768_v49, %v767_v48  ;;  %v2432_v53 = vpack.c.bf16 %v770_v52, %v769_v51  ;;  %v771_v54 = vld [vmem:[#allocation6 + $0x490] sm:$0xff]  ;;  %v772_v55 = vld [vmem:[#allocation6 + $0x498] sm:$0xff]  ;;  %v773_v57 = vld [vmem:[#allocation6 + $0x4a0] sm:$0xff]  ;;  %v3202_v52 = vmov 0.0  }
 0x1a4   : > { %2398 = vmatpush3.bf16.msra.mxu1 %v2397_v58  ;;  %2368 = vmatprep.subr.bf16.mxu0 %v2367_v59  ;;  %v2435_v56 = vpack.c.bf16 %v772_v55, %v771_v54  ;;  %v774_v58 = vld [vmem:[#allocation6 + $0x4a8] sm:$0xff]  ;;  %v603_v60 = vld [vmem:[%s3613_s28 + $0x40] sm:$0xff]  ;;  %v613_v62 = vld [vmem:[%s3613_s28 + $0x90] sm:$0xff] }
 0x1a5   : > { %2400 = vmatprep.subr.bf16.mxu1 %v2399_v63  ;;  %v2438_v59 = vpack.c.bf16 %v774_v58, %v773_v57  ;;  %v614_v61 = vld [vmem:[%s3613_s28 + $0x98] sm:$0xff]  ;;  %v624_v63 = vld [vmem:[%s3613_s28 + $0xe8] sm:$0xff]  ;;  %v623_v0 = vld [vmem:[%s3613_s28 + $0xe0] sm:$0xff] }
 0x1a6   : > { %v1201_v1 = vld [vmem:[%s3624_s1 + $0x8] sm:$0xff]  ;;  %v1200_v3 = vld [vmem:[%s3624_s1] sm:$0xff]  ;;  %v1203_v49 = vld [vmem:[%s3624_s1 + $0x18] sm:$0xff] }
 0x1a7   : > { %2370 = vmatpush3.bf16.msra.mxu0 %v2369_v5  ;;  %v1205_v2 = vld [vmem:[%s3624_s1 + $0x28] sm:$0xff]  ;;  %v1204_v5 = vld [vmem:[%s3624_s1 + $0x20] sm:$0xff] }
 0x1a8   : > { %2402 = vmatpush3.bf16.msra.mxu1 %v2401_v6  ;;  %2372 = vmatprep.subr.bf16.mxu0 %v2371_v7  ;;  %v2440_v4 = vpack.c.bf16 %v1205_v2, %v1201_v1  ;;  %v1209_v6 = vld [vmem:[%s3624_s1 + $0x48] sm:$0xff]  ;;  %v2442_v8 = vpack.c.bf16 %v1204_v5, %v1200_v3  ;;  %v1212_v11 = vld [vmem:[%s3624_s1 + $0x60] sm:$0xff] }
 0x1a9   : > { %2404 = vmatprep.subr.bf16.mxu1 %v2403_v10  ;;  %v1213_v7 = vld [vmem:[%s3624_s1 + $0x68] sm:$0xff]  ;;  %v1208_v10 = vld [vmem:[%s3624_s1 + $0x40] sm:$0xff] }
 0x1aa   : > { %v2444_v9 = vpack.c.bf16 %v1213_v7, %v1209_v6  ;;  %v1217_v12 = vld [vmem:[%s3624_s1 + $0x88] sm:$0xff]  ;;  %v1216_v16 = vld [vmem:[%s3624_s1 + $0x80] sm:$0xff] }
 0x1ab   : > { %2374 = vmatpush3.bf16.msra.mxu0 %v2373_v13  ;;  %v1221_v13 = vld [vmem:[%s3624_s1 + $0xa8] sm:$0xff]  ;;  %v1224_v22 = vld [vmem:[%s3624_s1 + $0xc0] sm:$0xff] }
 0x1ac   : > { %2406 = vmatpush3.bf16.msra.mxu1 %v2405_v14  ;;  %2407 = vmatprep.subr.bf16.mxu0 %v3201_v19  ;;  %v2446_v14 = vpack.c.bf16 %v1212_v11, %v1208_v10  ;;  %v2448_v15 = vpack.c.bf16 %v1221_v13, %v1217_v12  ;;  %v1232_v28 = vld [vmem:[%s3624_s1 + $0x100] sm:$0xff]  ;;  %v1257_v43 = vld [vmem:[%s3624_s1 + $0x1c8] sm:$0xff] }
 0x1ad   : > { %2441 = vmatprep.subr.bf16.mxu1 %v2440_v4  ;;  %v1236_v29 = vld [vmem:[%s3624_s1 + $0x120] sm:$0xff] }
 0x1ae   : > { %1010 = vmatmul.mubr.f32.vlgmr.msra.gmra.mrb[6].mxu0 %v599_v17  ;;  %v1220_v17 = vld [vmem:[%s3624_s1 + $0xa0] sm:$0xff] }
 0x1af   : > { %2409 = vmatpush1.bf16.msra.mxu0 %v2408_v18  ;;  %1090 = vmatmul.mubr.f32.vlgmr.msra.gmra.mrb[6].mxu1 %v601_v20  ;;  %v1225_v18 = vld [vmem:[%s3624_s1 + $0xc8] sm:$0xff]  ;;  %v2450_v20 = vpack.c.bf16 %v1220_v17, %v1216_v16  ;;  %v1244_v35 = vld [vmem:[%s3624_s1 + $0x160] sm:$0xff] }
 0x1b0   : > { %1014 = vmatprep.mubr.f32.mxu0 %v610_v23  ;;  %2410 = vmatprep.subr.bf16.mxu0 %v3201_v19  ;;  %v1228_v23 = vld [vmem:[%s3624_s1 + $0xe0] sm:$0xff] }
 0x1b1   : > { %1094 = vmatprep.mubr.f32.mxu1 %v612_v24  ;;  %2443 = vmatpush1.bf16.msra.mxu1 %v2442_v8  ;;  %v2454_v24 = vpack.c.bf16 %v1228_v23, %v1224_v22  ;;  %v1248_v40 = vld [vmem:[%s3624_s1 + $0x180] sm:$0xff] }
 0x1b2   : > { %1015 = vmatmul.mubr.f32.gmra.mrb[8].mxu0 %v609_v25  ;;  %2445 = vmatprep.subr.bf16.mxu1 %v2444_v9  ;;  %v1233_v25 = vld [vmem:[%s3624_s1 + $0x108] sm:$0xff]  ;;  %v1256_v46 = vld [vmem:[%s3624_s1 + $0x1c0] sm:$0xff] }
 0x1b3   : > { %2412 = vmatpush1.bf16.msra.mxu0 %v2411_v26  ;;  %1095 = vmatmul.mubr.f32.gmra.mrb[8].mxu1 %v611_v27  ;;  %v1237_v26 = vld [vmem:[%s3624_s1 + $0x128] sm:$0xff] }
 0x1b4   : > { %1019 = vmatprep.mubr.f32.mxu0 %v620_v30  ;;  %2413 = vmatprep.subr.bf16.mxu0 %v3201_v19  ;;  %v2456_v27 = vpack.c.bf16 %v1237_v26, %v1233_v25  ;;  %v2458_v30 = vpack.c.bf16 %v1236_v29, %v1232_v28 }
 0x1b5   : > { %1099 = vmatprep.mubr.f32.mxu1 %v622_v31  ;;  %2447 = vmatpush1.bf16.msra.mxu1 %v2446_v14  ;;  %v1241_v31 = vld [vmem:[%s3624_s1 + $0x148] sm:$0xff] }
 0x1b6   : > { %1020 = vmatmul.mubr.f32.gmra.mrb[10].mxu0 %v619_v32  ;;  %2449 = vmatprep.subr.bf16.mxu1 %v2448_v15  ;;  %v1245_v32 = vld [vmem:[%s3624_s1 + $0x168] sm:$0xff] }
 0x1b7   : > { %2415 = vmatpush1.bf16.msra.mxu0 %v2414_v33  ;;  %1100 = vmatmul.mubr.f32.gmra.mrb[10].mxu1 %v621_v34  ;;  %v2460_v33 = vpack.c.bf16 %v1245_v32, %v1241_v31  ;;  %v1240_v34 = vld [vmem:[%s3624_s1 + $0x140] sm:$0xff] }
 0x1b8   : > { %2416 = vmatprep.subr.bf16.mxu0 %v3201_v19  ;;  %1981 = vmatprep.mubr.msk.f32.mxu0 %vm775_vm0, %v604_v37  ;;  %v2462_v36 = vpack.c.bf16 %v1244_v35, %v1240_v34  ;;  %v1249_v37 = vld [vmem:[%s3624_s1 + $0x188] sm:$0xff] }
 0x1b9   : > { %2451 = vmatpush1.bf16.msra.mxu1 %v2450_v20  ;;  %1328 = vmatprep.mubr.f32.mxu1 %v3202_v52 }
 0x1bb   : > { %2418 = vmatpush1.bf16.msra.mxu0 %v2417_v38  ;;  %v1253_v38 = vld [vmem:[%s3624_s1 + $0x1a8] sm:$0xff] }
 0x1bc   : > { %2419 = vmatprep.subr.bf16.mxu0 %v3201_v19  ;;  %v2464_v39 = vpack.c.bf16 %v1253_v38, %v1249_v37 }
 0x1bf   : > { %2421 = vmatpush1.bf16.msra.mxu0 %v2420_v41  ;;  %v1252_v41 = vld [vmem:[%s3624_s1 + $0x1a0] sm:$0xff] }
 0x1c0   : > { %2422 = vmatprep.subr.bf16.mxu0 %v3201_v19  ;;  %v2466_v42 = vpack.c.bf16 %v1252_v41, %v1248_v40 }
 0x1c3   : > { %2424 = vmatpush1.bf16.msra.mxu0 %v2423_v44  ;;  %v1261_v44 = vld [vmem:[%s3624_s1 + $0x1e8] sm:$0xff] }
 0x1c4   : > { %2425 = vmatprep.subr.bf16.mxu0 %v3201_v19  ;;  %v2468_v45 = vpack.c.bf16 %v1261_v44, %v1257_v43  ;;  %v1984_v44 = vld [vmem:[#allocation8] ss:$0 sm:$0xff] }
 0x1c7   : > { %2427 = vmatpush1.bf16.msra.mxu0 %v2426_v47  ;;  %v1260_v47 = vld [vmem:[%s3624_s1 + $0x1e0] sm:$0xff] }
 0x1c8   : > { %2428 = vmatprep.subr.bf16.mxu0 %v3201_v19  ;;  %v2470_v48 = vpack.c.bf16 %v1260_v47, %v1256_v46  ;;  %v1202_v46 = vld [vmem:[%s3624_s1 + $0x10] sm:$0xff] }
 0x1c9   : > { %v1206_v47 = vld [vmem:[%s3624_s1 + $0x30] sm:$0xff] }
 0x1cb   : > { %2430 = vmatpush1.bf16.msra.mxu0 %v2429_v50  ;;  %v1207_v50 = vld [vmem:[%s3624_s1 + $0x38] sm:$0xff] }
 0x1cc   : > { %2431 = vmatprep.subr.bf16.mxu0 %v3201_v19  ;;  %v2472_v51 = vpack.c.bf16 %v1207_v50, %v1203_v49  ;;  %v1215_v49 = vld [vmem:[%s3624_s1 + $0x78] sm:$0xff] }
 0x1cf   : > { %2433 = vmatpush1.bf16.msra.mxu0 %v2432_v53 }
 0x1d0   : > { %2434 = vmatprep.subr.bf16.mxu0 %v3201_v19 }
 0x1d3   : > { %2436 = vmatpush1.bf16.msra.mxu0 %v2435_v56 }
 0x1d4   : > { %2437 = vmatprep.subr.bf16.mxu0 %v3201_v19  ;;  %v1229_v19 = vld [vmem:[%s3624_s1 + $0xe8] sm:$0xff] }
 0x1d5   : > { %v2452_v21 = vpack.c.bf16 %v1229_v19, %v1225_v18 }
 0x1d7   : > { %2439 = vmatpush1.bf16.msra.mxu0 %v2438_v59  ;;  %2453 = vmatprep.subr.bf16.mxu1 %v2452_v21 }
 0x1d8   : > { %2455 = vmatpush1.bf16.msra.mxu1 %v2454_v24 }
 0x1d9   : > { %2457 = vmatprep.subr.bf16.mxu1 %v2456_v27 }
 0x1da   : > { %1170 = vmatmul.mubr.f32.vlgmr.msra.gmra.mrb[12].mxu0 %v603_v60 }
 0x1db   : > { %1982 = vmatprep.mubr.msk.f32.mxu0 %vm775_vm0, %v614_v61 }
 0x1dc   : > { %2459 = vmatpush1.bf16.msra.mxu1 %v2458_v30 }
 0x1dd   : > { %2461 = vmatprep.subr.bf16.mxu1 %v2460_v33 }
 0x1de   : > { %1175 = vmatmul.mubr.f32.gmra.mrb[14].mxu0 %v613_v62 }
 0x1df   : > { %1983 = vmatprep.mubr.msk.f32.mxu0 %vm775_vm0, %v624_v63 }
 0x1e0   : > { %2463 = vmatpush1.bf16.msra.mxu1 %v2462_v36 }
 0x1e1   : > { %2465 = vmatprep.subr.bf16.mxu1 %v2464_v39 }
 0x1e2   : > { %1180 = vmatmul.mubr.f32.gmra.mrb[16].mxu0 %v623_v0 }
 0x1e4   : > { %2467 = vmatpush1.bf16.msra.mxu1 %v2466_v42 }
 0x1e5   : > { %2469 = vmatprep.subr.bf16.mxu1 %v2468_v45 }
 0x1e8   : > { %2471 = vmatpush1.bf16.msra.mxu1 %v2470_v48  ;;  %v1211_v48 = vld [vmem:[%s3624_s1 + $0x58] sm:$0xff] }
 0x1e9   : > { %2473 = vmatprep.subr.bf16.mxu1 %v2472_v51  ;;  %v2474_v51 = vpack.c.bf16 %v1206_v47, %v1202_v46  ;;  %v1508_v46 = vld [vmem:[#allocation12 + $0x180] sm:$0xff] (!%p1985_p0)  ;;  %v1509_v47 = vld [vmem:[#allocation12 + $0x188] sm:$0xff] (!%p1985_p0) }
 0x261   : > { %v2025_v53 = vpop.f32.mrb[0].mxu0 }
 0x262   : > { %v2066_v54 = vpop.f32.mrb[0].mxu1  ;;  %v2026_v55 = vpop.f32.mrb[1].mxu0 }
 0x263   : > { %v2027_v56 = vadd.f32 %v2026_v55, %v2025_v53  ;;  %v2067_v57 = vpop.f32.mrb[1].mxu1  ;;  %v1210_v55 = vld [vmem:[%s3624_s1 + $0x50] sm:$0xff] }
 0x264   : > { %v2068_v58 = vadd.f32 %v2067_v57, %v2066_v54  ;;  %v2476_v54 = vpack.c.bf16 %v1215_v49, %v1211_v48  ;;  %v1219_v57 = vld [vmem:[%s3624_s1 + $0x98] sm:$0xff]  ;;  %v2536_v49 = vpack.c.bf16 (!%p1985_p0), %v1509_v47, %v1508_v46 }
 0x265   : > { %v2028_v62 = vpop.f32.mrb[2].mxu0  ;;  %v1502_v46 = vld [vmem:[#allocation12 + $0x150] sm:$0xff] (!%p1985_p0) }
 0x266   : > { %v932_v59 = vadd.f32 %v2068_v58, %v2027_v56  ;;  %v2069_v60 = vpop.f32.mrb[2].mxu1  ;;  %v2029_v0 = vpop.f32.mrb[3].mxu0  ;;  %v1214_v56 = vld [vmem:[%s3624_s1 + $0x70] sm:$0xff]  ;;  %v1223_v58 = vld [vmem:[%s3624_s1 + $0xb8] sm:$0xff] }
 0x267   : > { %v2070_v61 = vpop.f32.mrb[3].mxu1  ;;  %v2030_v1 = vadd.f32 %v2029_v0, %v2028_v62  ;;  %v1222_v62 = vld [vmem:[%s3624_s1 + $0xb0] sm:$0xff]  ;;  %v1231_v0 = vld [vmem:[%s3624_s1 + $0xf8] sm:$0xff] }
 0x268   : > { %v2071_v63 = vadd.f32 %v2070_v61, %v2069_v60  ;;  %v2480_v60 = vpack.c.bf16 %v1223_v58, %v1219_v57  ;;  %v1218_v61 = vld [vmem:[%s3624_s1 + $0x90] sm:$0xff]  ;;  %v1463_v57 = vld [vmem:[#allocation12 + $0x18] sm:$0xff] (!%p1985_p0) }
 0x269   : > { %v2031_v5 = vpop.f32.mrb[4].mxu0 }
 0x26a   : > { %v2072_v2 = vpop.f32.mrb[4].mxu1  ;;  %v937_v4 = vadd.f32 %v2071_v63, %v2030_v1  ;;  %v2032_v7 = vpop.f32.mrb[5].mxu0  ;;  %v1227_v63 = vld [vmem:[%s3624_s1 + $0xd8] sm:$0xff]  ;;  %v2482_v1 = vpack.c.bf16 %v1222_v62, %v1218_v61 }
 0x26b   : > { %v2073_v3 = vpop.f32.mrb[5].mxu1  ;;  %v2033_v8 = vadd.f32 %v2032_v7, %v2031_v5  ;;  %v1235_v5 = vld [vmem:[%s3624_s1 + $0x118] sm:$0xff] }
 0x26c   : > { %v2074_v6 = vadd.f32 %v2073_v3, %v2072_v2  ;;  %v2484_v2 = vpack.c.bf16 %v1231_v0, %v1227_v63  ;;  %v1226_v3 = vld [vmem:[%s3624_s1 + $0xd0] sm:$0xff]  ;;  %v1511_v61 = vld [vmem:[#allocation12 + $0x198] sm:$0xff] (!%p1985_p0) }
 0x26d   : > { %v1494_v62 = vld [vmem:[#allocation12 + $0x110] sm:$0xff] (!%p1985_p0)  ;;  %v1495_v0 = vld [vmem:[#allocation12 + $0x118] sm:$0xff] (!%p1985_p0) }
 0x26e   : > { %v942_v9 = vadd.f32 %v2074_v6, %v2033_v8  ;;  %v1234_v8 = vld [vmem:[%s3624_s1 + $0x110] sm:$0xff] }
 0x281   : > { %v2107_v10 = vpop.f32.mrb[6].mxu0 }
 0x282   : > { %v2108_v11 = vpop.f32.mrb[7].mxu0  ;;  %v2148_v12 = vpop.f32.mrb[6].mxu1 }
 0x283   : > { %v2109_v13 = vadd.f32 %v2108_v11, %v2107_v10  ;;  %v2149_v14 = vpop.f32.mrb[7].mxu1  ;;  %v1243_v10 = vld [vmem:[%s3624_s1 + $0x158] sm:$0xff] }
 0x284   : > { %v2150_v15 = vadd.f32 %v2149_v14, %v2148_v12  ;;  %v1247_v11 = vld [vmem:[%s3624_s1 + $0x178] sm:$0xff]  ;;  %v1242_v14 = vld [vmem:[%s3624_s1 + $0x150] sm:$0xff] }
 0x285   : > { %v1012_v16 = vadd.f32 %v2109_v13, %v932_v59  ;;  %v2110_v17 = vpop.f32.mrb[8].mxu0  ;;  %v2478_v59 = vpack.c.bf16 %v1214_v56, %v1210_v55  ;;  %v2492_v13 = vpack.c.bf16 %v1247_v11, %v1243_v10  ;;  %v1479_v55 = vld [vmem:[#allocation12 + $0x98] sm:$0xff] (!%p1985_p0)  ;;  %v1462_v56 = vld [vmem:[#allocation12 + $0x10] sm:$0xff] (!%p1985_p0) }
 0x286   : > { %v2111_v18 = vpop.f32.mrb[9].mxu0  ;;  %v2151_v19 = vpop.f32.mrb[8].mxu1 }
 0x287   : > { %v2112_v20 = vadd.f32 %v2111_v18, %v2110_v17  ;;  %v2152_v21 = vpop.f32.mrb[9].mxu1  ;;  %v1092_v22 = vadd.f32 %v2150_v15, %v1012_v16  ;;  %v1246_v15 = vld [vmem:[%s3624_s1 + $0x170] sm:$0xff]  ;;  %v1251_v16 = vld [vmem:[%s3624_s1 + $0x198] sm:$0xff] }
 0x288   : > { %v2153_v23 = vadd.f32 %v2152_v21, %v2151_v19  ;;  %v1255_v17 = vld [vmem:[%s3624_s1 + $0x1b8] sm:$0xff]  ;;  %v2494_v18 = vpack.c.bf16 %v1246_v15, %v1242_v14  ;;  %v1254_v21 = vld [vmem:[%s3624_s1 + $0x1b0] sm:$0xff] }
 0x289   : > { %v1017_v24 = vadd.f32 %v2112_v20, %v937_v4  ;;  %v2113_v25 = vpop.f32.mrb[10].mxu0  ;;  %v1230_v4 = vld [vmem:[%s3624_s1 + $0xf0] sm:$0xff]  ;;  %v2496_v19 = vpack.c.bf16 %v1255_v17, %v1251_v16  ;;  %v1467_v17 = vld [vmem:[#allocation12 + $0x38] sm:$0xff] (!%p1985_p0) }
 0x28a   : > { %v2114_v26 = vpop.f32.mrb[11].mxu0  ;;  %v2154_v27 = vpop.f32.mrb[10].mxu1  ;;  %v2486_v6 = vpack.c.bf16 %v1230_v4, %v1226_v3  ;;  %v1250_v20 = vld [vmem:[%s3624_s1 + $0x190] sm:$0xff]  ;;  %v2542_v3 = vpack.c.bf16 (!%p1985_p0), %v1495_v0, %v1494_v62 }
 0x28b   : > { %v2115_v28 = vadd.f32 %v2114_v26, %v2113_v25  ;;  %v2155_v29 = vpop.f32.mrb[11].mxu1  ;;  %v1097_v30 = vadd.f32 %v2153_v23, %v1017_v24  ;;  %v1263_v23 = vld [vmem:[%s3624_s1 + $0x1f8] sm:$0xff]  ;;  %v2498_v24 = vpack.c.bf16 %v1254_v21, %v1250_v20  ;;  %v1258_v26 = vld [vmem:[%s3624_s1 + $0x1d0] sm:$0xff] }
 0x28c   : > { %v2156_v31 = vadd.f32 %v2155_v29, %v2154_v27  ;;  %v1262_v27 = vld [vmem:[%s3624_s1 + $0x1f0] sm:$0xff] }
 0x28d   : > { %v1022_v32 = vadd.f32 %v2115_v28, %v942_v9  ;;  %v1238_v9 = vld [vmem:[%s3624_s1 + $0x130] sm:$0xff]  ;;  %v2502_v28 = vpack.c.bf16 %v1262_v27, %v1258_v26  ;;  %v1516_v27 = vld [vmem:[#allocation12 + $0x1c0] sm:$0xff] (!%p1985_p0) }
 0x28e   : > { %v2490_v12 = vpack.c.bf16 %v1238_v9, %v1234_v8  ;;  %v1196_v29 = vld [vmem:[#allocation2] sm:$0xff]  ;;  %v1496_v8 = vld [vmem:[#allocation12 + $0x120] sm:$0xff] (!%p1985_p0) }
 0x28f   : > { %v1102_v33 = vadd.f32 %v2156_v31, %v1022_v32  ;;  %v1497_v9 = vld [vmem:[#allocation12 + $0x128] sm:$0xff] (!%p1985_p0)  ;;  %v1466_v14 = vld [vmem:[#allocation12 + $0x30] sm:$0xff] (!%p1985_p0) }
 0x290   : > { %v2546_v15 = vpack.c.bf16 (!%p1985_p0), %v1497_v9, %v1496_v8  ;;  %v1498_v21 = vld [vmem:[#allocation12 + $0x130] sm:$0xff] (!%p1985_p0)  ;;  %v2518_v26 = vpack.c.bf16 (!%p1985_p0), %v1467_v17, %v1466_v14  ;;  %v1505_v62 = vld [vmem:[#allocation12 + $0x168] sm:$0xff] (!%p1985_p0) }
 0x2ad   : > { %v1171_v34 = vpop.f32.mrb[12].mxu0 }
 0x2ae   : > { %v1172_v35 = vadd.f32 %v1171_v34, %v1092_v22  ;;  %v1173_v36 = vpop.f32.mrb[13].mxu0  ;;  %v1259_v22 = vld [vmem:[%s3624_s1 + $0x1d8] sm:$0xff] }
 0x2af   : > { %v2500_v25 = vpack.c.bf16 %v1263_v23, %v1259_v22  ;;  %v1199_v36 = vld [vmem:[#allocation2 + $0x18] sm:$0xff]  ;;  %v1499_v22 = vld [vmem:[#allocation12 + $0x138] sm:$0xff] (!%p1985_p0) }
 0x2b0   : > { %v1484_v23 = vld [vmem:[#allocation12 + $0xc0] sm:$0xff] (!%p1985_p0) }
 0x2b1   : > { %v1176_v37 = vpop.f32.mrb[14].mxu0 }
 0x2b2   : > { %v1177_v38 = vadd.f32 %v1176_v37, %v1097_v30  ;;  %v1178_v39 = vpop.f32.mrb[15].mxu0  ;;  %v1197_v30 = vld [vmem:[#allocation2 + $0x8] sm:$0xff] }
 0x2b4   : > { %v1185_v40 = vmax.f32 %v1172_v35, %v1177_v38  ;;  %v1198_v35 = vld [vmem:[#allocation2 + $0x10] sm:$0xff] }
 0x2b5   : > { %v1181_v41 = vpop.f32.mrb[16].mxu0 }
 0x2b6   : > { %v1182_v42 = vadd.f32 %v1181_v41, %v1102_v33  ;;  %v1183_v43 = vpop.f32.mrb[17].mxu0  ;;  %v1476_v41 = vld [vmem:[#allocation12 + $0x80] sm:$0xff] (!%p1985_p0) }
 0x2b7   : > { %v1460_v43 = vld [vmem:[#allocation12] sm:$0xff] (!%p1985_p0) }
 0x2b8   : > { %v1186_v45 = vmax.f32 %v1185_v40, %v1182_v42  ;;  %v1477_v42 = vld [vmem:[#allocation12 + $0x88] sm:$0xff] (!%p1985_p0) }
 0x2ba   : > { %v1194_v50 = vadd.f32 %v1984_v44, %v1186_v45  ;;  %v2504_v44 = vpack.c.bf16 (!%p1985_p0), %v1477_v42, %v1476_v41  ;;  %v1461_v45 = vld [vmem:[#allocation12 + $0x8] sm:$0xff] (!%p1985_p0) }
 0x2bb   : > { %v2506_v48 = vpack.c.bf16 (!%p1985_p0), %v1461_v45, %v1460_v43  ;;  %v1471_v45 = vld [vmem:[#allocation12 + $0x58] sm:$0xff] (!%p1985_p0) }
 0x2bc   : > { %v1195_v53 = vmax.f32 %v1194_v50, 0.0  ;;  %v1492_v50 = vld [vmem:[#allocation12 + $0x100] sm:$0xff] (!%p1985_p0)  ;;  %2505 = vmatprep.subr.bf16.mxu0 (!%p1985_p0), %v2504_v44  ;;  %v1470_v44 = vld [vmem:[#allocation12 + $0x50] sm:$0xff] (!%p1985_p0) }
 0x2bd   : > { %2507 = vmatpush3.bf16.msra.mxu0 (!%p1985_p0), %v2506_v48  ;;  %v1503_v48 = vld [vmem:[#allocation12 + $0x158] sm:$0xff] (!%p1985_p0) }
 0x2be   : > { %1329 = vmatmul.mubr.f32.vlgmr.msra.gmra.mrb[12].mxu1 %v1195_v53 }
 0x2bf   : > { %2475 = vmatpush1.bf16.msra.mxu1 %v2474_v51  ;;  %1399 = vmatprep.mubr.f32.mxu1 %v3202_v52  ;;  %v1239_v52 = vld [vmem:[%s3624_s1 + $0x138] sm:$0xff]  ;;  %v1493_v51 = vld [vmem:[#allocation12 + $0x108] sm:$0xff] (!%p1985_p0) }
 0x2c0   : > { %2477 = vmatprep.subr.bf16.mxu1 %v2476_v54  ;;  %v2488_v7 = vpack.c.bf16 %v1239_v52, %v1235_v5  ;;  %v2538_v54 = vpack.c.bf16 (!%p1985_p0), %v1493_v51, %v1492_v50  ;;  %v1464_v5 = vld [vmem:[#allocation12 + $0x20] sm:$0xff] (!%p1985_p0)  ;;  %v1465_v52 = vld [vmem:[#allocation12 + $0x28] sm:$0xff] (!%p1985_p0) }
 0x2c1   : > { %v2514_v10 = vpack.c.bf16 (!%p1985_p0), %v1465_v52, %v1464_v5  ;;  %v1489_v50 = vld [vmem:[#allocation12 + $0xe8] sm:$0xff] (!%p1985_p0)  ;;  %v1491_v5 = vld [vmem:[#allocation12 + $0xf8] sm:$0xff] (!%p1985_p0)  ;;  %v1522_v52 = vld [vmem:[#allocation12 + $0x1f0] sm:$0xff] (!%p1985_p0) }
 0x2c3   : > { %2479 = vmatpush1.bf16.msra.mxu1 %v2478_v59  ;;  %v2510_v59 = vpack.c.bf16 (!%p1985_p0), %v1463_v57, %v1462_v56  ;;  %v1520_v56 = vld [vmem:[#allocation12 + $0x1e0] sm:$0xff] (!%p1985_p0)  ;;  %v1521_v57 = vld [vmem:[#allocation12 + $0x1e8] sm:$0xff] (!%p1985_p0) }
 0x2c4   : > { %2481 = vmatprep.subr.bf16.mxu1 %v2480_v60  ;;  %v1510_v60 = vld [vmem:[#allocation12 + $0x190] sm:$0xff] (!%p1985_p0) }
 0x2c5   : > { %v2540_v63 = vpack.c.bf16 (!%p1985_p0), %v1511_v61, %v1510_v60  ;;  %v1473_v60 = vld [vmem:[#allocation12 + $0x68] sm:$0xff] (!%p1985_p0)  ;;  %v1504_v61 = vld [vmem:[#allocation12 + $0x160] sm:$0xff] (!%p1985_p0) }
 0x2c7   : > { %2483 = vmatpush1.bf16.msra.mxu1 %v2482_v1  ;;  %v1480_v1 = vld [vmem:[#allocation12 + $0xa0] sm:$0xff] (!%p1985_p0) }
 0x2c8   : > { %2485 = vmatprep.subr.bf16.mxu1 %v2484_v2  ;;  %v1481_v2 = vld [vmem:[#allocation12 + $0xa8] sm:$0xff] (!%p1985_p0) }
 0x2c9   : > { %v2512_v4 = vpack.c.bf16 (!%p1985_p0), %v1481_v2, %v1480_v1  ;;  %v1490_v1 = vld [vmem:[#allocation12 + $0xf0] sm:$0xff] (!%p1985_p0) }
 0x2cb   : > { %2487 = vmatpush1.bf16.msra.mxu1 %v2486_v6  ;;  %v1512_v6 = vld [vmem:[#allocation12 + $0x1a0] sm:$0xff] (!%p1985_p0) }
 0x2cc   : > { %2489 = vmatprep.subr.bf16.mxu1 %v2488_v7  ;;  %v1513_v7 = vld [vmem:[#allocation12 + $0x1a8] sm:$0xff] (!%p1985_p0) }
 0x2cd   : > { %v2544_v11 = vpack.c.bf16 (!%p1985_p0), %v1513_v7, %v1512_v6 }
 0x2cf   : > { %2491 = vmatpush1.bf16.msra.mxu1 %v2490_v12  ;;  %v1482_v12 = vld [vmem:[#allocation12 + $0xb0] sm:$0xff] (!%p1985_p0) }
 0x2d0   : > { %2493 = vmatprep.subr.bf16.mxu1 %v2492_v13  ;;  %v1483_v13 = vld [vmem:[#allocation12 + $0xb8] sm:$0xff] (!%p1985_p0) }
 0x2d1   : > { %v2516_v16 = vpack.c.bf16 (!%p1985_p0), %v1483_v13, %v1482_v12 }
 0x2d3   : > { %2495 = vmatpush1.bf16.msra.mxu1 %v2494_v18  ;;  %v1514_v18 = vld [vmem:[#allocation12 + $0x1b0] sm:$0xff] (!%p1985_p0) }
 0x2d4   : > { %2497 = vmatprep.subr.bf16.mxu1 %v2496_v19  ;;  %v1515_v19 = vld [vmem:[#allocation12 + $0x1b8] sm:$0xff] (!%p1985_p0) }
 0x2d5   : > { %v2548_v20 = vpack.c.bf16 (!%p1985_p0), %v1515_v19, %v1514_v18  ;;  %v2562_v19 = vpack.c.bf16 (!%p1985_p0), %v1505_v62, %v1504_v61  ;;  %v1687_v61 = vld [vmem:[#allocation15 + $0x68] sm:$0xff] (!%p1985_p0) }
 0x2d7   : > { %2499 = vmatpush1.bf16.msra.mxu1 %v2498_v24  ;;  %v1424_v24 = vlaneseq (!%p1985_p0) }
 0x2d8   : > { %2501 = vmatprep.subr.bf16.mxu1 %v2500_v25  ;;  %v1485_v25 = vld [vmem:[#allocation12 + $0xc8] sm:$0xff] (!%p1985_p0) }
 0x2db   : > { %2503 = vmatpush1.bf16.msra.mxu1 %v2502_v28  ;;  %v1517_v28 = vld [vmem:[#allocation12 + $0x1c8] sm:$0xff] (!%p1985_p0) }
 0x2dc   : > { %2537 = vmatprep.subr.bf16.mxu1 (!%p1985_p0), %v2536_v49  ;;  %v1488_v49 = vld [vmem:[#allocation12 + $0xe0] sm:$0xff] (!%p1985_p0) }
 0x2dd   : > { %v2528_v0 = vpack.c.bf16 (!%p1985_p0), %v1489_v50, %v1488_v49  ;;  %v1680_v50 = vld [vmem:[#allocation15 + $0x30] sm:$0xff] (!%p1985_p0) }
 0x2de   : > { %1400 = vmatmul.mubr.f32.vlgmr.msra.gmra.mrb[14].mxu1 %v1195_v53  ;;  %v1478_v53 = vld [vmem:[#allocation12 + $0x90] sm:$0xff] (!%p1985_p0) }
 0x2df   : > { %v2508_v58 = vpack.c.bf16 (!%p1985_p0), %v1479_v55, %v1478_v53  ;;  %2539 = vmatpush3.bf16.msra.mxu1 (!%p1985_p0), %v2538_v54  ;;  %v1472_v55 = vld [vmem:[#allocation12 + $0x60] sm:$0xff] (!%p1985_p0) }
 0x2e0   : > { %2541 = vmatprep.subr.bf16.mxu1 (!%p1985_p0), %v2540_v63  ;;  %v2558_v63 = vpack.c.bf16 (!%p1985_p0), %v1503_v48, %v1502_v46  ;;  %v2530_v14 = vpack.c.bf16 (!%p1985_p0), %v1473_v60, %v1472_v55  ;;  %v1679_v48 = vld [vmem:[#allocation15 + $0x28] sm:$0xff] (!%p1985_p0)  ;;  %v1686_v60 = vld [vmem:[#allocation15 + $0x60] sm:$0xff] (!%p1985_p0) }
 0x2e1   : > { %2509 = vmatprep.subr.bf16.mxu0 (!%p1985_p0), %v2508_v58  ;;  %v1683_v55 = vld [vmem:[#allocation15 + $0x48] sm:$0xff] (!%p1985_p0)  ;;  %v2587_v62 = vpack.c.bf16 (!%p1985_p0), %v1687_v61, %v1686_v60 }
 0x2e2   : > { %2511 = vmatpush3.bf16.msra.mxu0 (!%p1985_p0), %v2510_v59  ;;  %v2526_v59 = vpack.c.bf16 (!%p1985_p0), %v1471_v45, %v1470_v44  ;;  %v1676_v44 = vld [vmem:[#allocation15 + $0x10] sm:$0xff] (!%p1985_p0)  ;;  %v1677_v45 = vld [vmem:[#allocation15 + $0x18] sm:$0xff] (!%p1985_p0) }
 0x2e3   : > { %2543 = vmatpush3.bf16.msra.mxu1 (!%p1985_p0), %v2542_v3  ;;  %2513 = vmatprep.subr.bf16.mxu0 (!%p1985_p0), %v2512_v4  ;;  %v1422_v3 = vld [vmem:[#allocation11] sm:$0xf] (!%p1985_p0)  ;;  %v2560_v4 = vpack.c.bf16 (!%p1985_p0), %v1521_v57, %v1520_v56  ;;  %v2572_v46 = vpack.c.bf16 (!%p1985_p0), %v1677_v45, %v1676_v44  ;;  %v1684_v57 = vld [vmem:[#allocation15 + $0x50] sm:$0xff] (!%p1985_p0) }
 0x2e4   : > { %2545 = vmatprep.subr.bf16.mxu1 (!%p1985_p0), %v2544_v11 }
 0x2e6   : > { %2515 = vmatpush3.bf16.msra.mxu0 (!%p1985_p0), %v2514_v10  ;;  %v1523_v10 = vld [vmem:[#allocation12 + $0x1f8] sm:$0xff] (!%p1985_p0) }
 0x2e7   : > { %2547 = vmatpush3.bf16.msra.mxu1 (!%p1985_p0), %v2546_v15  ;;  %2517 = vmatprep.subr.bf16.mxu0 (!%p1985_p0), %v2516_v16  ;;  %v1474_v15 = vld [vmem:[#allocation12 + $0x70] sm:$0xff] (!%p1985_p0) }
 0x2e8   : > { %2549 = vmatprep.subr.bf16.mxu1 (!%p1985_p0), %v2548_v20  ;;  %v2532_v20 = vpack.c.bf16 (!%p1985_p0), %v1491_v5, %v1490_v1 }
 0x2ea   : > { %2519 = vmatpush3.bf16.msra.mxu0 (!%p1985_p0), %v2518_v26  ;;  %v1506_v26 = vld [vmem:[#allocation12 + $0x170] sm:$0xff] (!%p1985_p0) }
 0x391   : > { %v1330_v31 = vpop.f32.mrb[12].mxu1 }
 0x392   : > { %v1406_v32 = vadd.f32 %v1330_v31, %v1196_v29  ;;  %v1332_v33 = vpop.f32.mrb[13].mxu1  ;;  %v2550_v29 = vpack.c.bf16 (!%p1985_p0), %v1499_v22, %v1498_v21  ;;  %v1468_v31 = vld [vmem:[#allocation12 + $0x40] sm:$0xff] (!%p1985_p0)  ;;  %v1475_v21 = vld [vmem:[#allocation12 + $0x78] sm:$0xff] (!%p1985_p0)  ;;  %v1453_v22 = vld [vmem:[#allocation18 + $0x8] sm:$0xff] (!%p1985_p0) }
 0x393   : > { %v1407_v34 = vadd.f32 %v1332_v33, %v1197_v30  ;;  %v2520_v30 = vpack.c.bf16 (!%p1985_p0), %v1485_v25, %v1484_v23  ;;  %v1500_v33 = vld [vmem:[#allocation12 + $0x140] sm:$0xff] (!%p1985_p0)  ;;  %v2564_v25 = vpack.c.bf16 (!%p1985_p0), %v1523_v10, %v1522_v52 }
 0x394   : > { %1410 = vst [vmem:[#allocation2] sm:$0xff] %v1406_v32  ;;  %v1469_v32 = vld [vmem:[#allocation12 + $0x48] sm:$0xff] (!%p1985_p0)  ;;  %2551 = vmatpush3.bf16.msra.mxu1 (!%p1985_p0), %v2550_v29  ;;  %v1455_v23 = vld [vmem:[#allocation18 + $0x18] sm:$0xff] (!%p1985_p0) }
 0x395   : > { %1411 = vst [vmem:[#allocation2 + $0x8] sm:$0xff] %v1407_v34  ;;  %v2552_v34 = vpack.c.bf16 (!%p1985_p0), %v1517_v28, %v1516_v27  ;;  %v2522_v41 = vpack.c.bf16 (!%p1985_p0), %v1469_v32, %v1468_v31  ;;  %2521 = vmatprep.subr.bf16.mxu0 (!%p1985_p0), %v2520_v30  ;;  %v1507_v27 = vld [vmem:[#allocation12 + $0x178] sm:$0xff] (!%p1985_p0)  ;;  %v2534_v31 = vpack.c.bf16 (!%p1985_p0), %v1475_v21, %v1474_v15 }
 0x397   : > { %2553 = vmatprep.subr.bf16.mxu1 (!%p1985_p0), %v2552_v34  ;;  %2523 = vmatpush3.bf16.msra.mxu0 (!%p1985_p0), %v2522_v41 }
 0x39b   : > { %v1418_v7 = vld [vmem:[#allocation2] sm:$0xff] (!%p1985_p0) }
 0x39c   : > { %v1419_v2 = vld [vmem:[#allocation2 + $0x8] sm:$0xff] (!%p1985_p0) }
 0x3af   : > { %1417 = sbr.rel (%p1985_p0) target bundleno = 1400 (0x578), region = 116 }
 0x3b1   : > { %v1401_v37 = vpop.f32.mrb[14].mxu1 }
 0x3b2   : > { %v1408_v38 = vadd.f32 %v1401_v37, %v1198_v35  ;;  %v1403_v39 = vpop.f32.mrb[15].mxu1  ;;  %v1501_v35 = vld [vmem:[#allocation12 + $0x148] sm:$0xff] (!%p1985_p0)  ;;  %v1487_v37 = vld [vmem:[#allocation12 + $0xd8] sm:$0xff] (!%p1985_p0) }
 0x3b3   : > { %v1409_v40 = vadd.f32 %v1403_v39, %v1199_v36  ;;  %v1486_v36 = vld [vmem:[#allocation12 + $0xd0] sm:$0xff] (!%p1985_p0)  ;;  %v2554_v42 = vpack.c.bf16 (!%p1985_p0), %v1501_v35, %v1500_v33  ;;  %v1452_v33 = vld [vmem:[#allocation18] sm:$0xff] (!%p1985_p0) }
 0x3b4   : > { %1412 = vst [vmem:[#allocation2 + $0x10] sm:$0xff] %v1408_v38  ;;  %v1425_v38 = vshrl.u32 (!%p1985_p0), %v1424_v24, 7  ;;  %v1518_v39 = vld [vmem:[#allocation12 + $0x1d0] sm:$0xff] (!%p1985_p0)  ;;  %v2524_v43 = vpack.c.bf16 (!%p1985_p0), %v1487_v37, %v1486_v36  ;;  %v2566_v36 = vpack.c.bf16 (!%p1985_p0), %v1507_v27, %v1506_v26 }
 0x3b5   : > { %1413 = vst [vmem:[#allocation2 + $0x18] sm:$0xff] %v1409_v40  ;;  %v1519_v40 = vld [vmem:[#allocation12 + $0x1d8] sm:$0xff] (!%p1985_p0)  ;;  %2555 = vmatpush3.bf16.msra.mxu1 (!%p1985_p0), %v2554_v42 }
 0x3b6   : > { %v2556_v47 = vpack.c.bf16 %v1519_v40, %v1518_v39  ;;  %v1430_v51 = vsub.s32 1, %v1425_v38  ;;  %v1426_v53 = vsub.s32 0, %v1425_v38  ;;  %v1438_v54 = vsub.s32 3, %v1425_v38  ;;  %2525 = vmatprep.subr.bf16.mxu0 %v2524_v43  ;;  %v1454_v37 = vld [vmem:[#allocation18 + $0x10] sm:$0xff]  ;;  %v1675_v39 = vld [vmem:[#allocation15 + $0x8] sm:$0xff] }
 0x3b7   : > { %v1434_v58 = vsub.s32 2, %v1425_v38  ;;  %2527 = vmatpush3.bf16.msra.mxu0 %v2526_v59  ;;  %v1674_v38 = vld [vmem:[#allocation15] sm:$0xff]  ;;  %v3203_v43 = vmov 0.0|0.0  }
 0x3b8   : > { %2557 = vmatprep.subr.bf16.mxu1 %v2556_v47  ;;  %v1431_v6 = vrot.slane %v1422_v3, %v1430_v51  ;;  %v1427_v8 = vrot.slane %v1422_v3, %v1426_v53  ;;  %v1439_v9 = vrot.slane %v1422_v3, %v1438_v54  ;;  %2529 = vmatprep.subr.bf16.mxu0 %v2528_v0  ;;  %v1678_v47 = vld [vmem:[#allocation15 + $0x20] sm:$0xff]  ;;  %v1681_v51 = vld [vmem:[#allocation15 + $0x38] sm:$0xff] }
 0x3b9   : > { %v1435_v13 = vrot.slane %v1422_v3, %v1434_v58  ;;  %2559 = vmatpush3.bf16.msra.mxu1 %v2558_v63  ;;  %v2569_v42 = vpack.c.bf16 %v1675_v39, %v1674_v38  ;;  %v2575_v49 = vpack.c.bf16 %v1679_v48, %v1678_v47  ;;  %v2578_v53 = vpack.c.bf16 %v1681_v51, %v1680_v50  ;;  %v1682_v54 = vld [vmem:[#allocation15 + $0x40] sm:$0xff]  ;;  %v1685_v58 = vld [vmem:[#allocation15 + $0x58] sm:$0xff]  ;;  %v1688_v63 = vld [vmem:[#allocation15 + $0x70] sm:$0xff] }
 0x3ba   : > { %v1445_v16 = vadd.f32 %v1431_v6, %v1419_v2  ;;  %v1444_v17 = vadd.f32 %v1427_v8, %v1418_v7  ;;  %2561 = vmatprep.subr.bf16.mxu1 %v2560_v4  ;;  %v2581_v56 = vpack.c.bf16 %v1683_v55, %v1682_v54  ;;  %v2584_v59 = vpack.c.bf16 %v1685_v58, %v1684_v57  ;;  %v1689_v0 = vld [vmem:[#allocation15 + $0x78] sm:$0xff] }
 0x3bb   : > { %v1420_v12 = vld [vmem:[#allocation2 + $0x10] sm:$0xff]  ;;  %2531 = vmatpush3.bf16.msra.mxu0 %v2530_v14  ;;  %v2590_v1 = vpack.c.bf16 %v1689_v0, %v1688_v63  ;;  %v3205_v2 = vmov 0.0   ;;  %v1987_v14 = vld [vmem:[#allocation17] ss:$0 sm:$0xff] }
 0x3bc   : > { %v1421_v11 = vld [vmem:[#allocation2 + $0x18] sm:$0xff]  ;;  %v1446_v24 = vadd.f32 %v1435_v13, %v1420_v12  ;;  %v1449_v28 = vmax.f32 %v1445_v16, 0.0  ;;  %v1448_v30 = vmax.f32 %v1444_v17, 0.0  ;;  %2533 = vmatprep.subr.bf16.mxu0 %v2532_v20  ;;  %v1986_v4 = vld [vmem:[#allocation14] ss:$0 sm:$0xff] }
 0x3bd   : > { %v1447_v18 = vadd.f32 %v1439_v9, %v1421_v11  ;;  %2563 = vmatpush3.bf16.msra.mxu1 %v2562_v19  ;;  %v1672_v11 = vld [vmem:[#allocation20] sm:$0xff] }
 0x3be   : > { %v1457_v32 = vmul.f32 %v1453_v22, %v1449_v28  ;;  %v1450_v35 = vmax.f32 %v1446_v24, 0.0  ;;  %2565 = vmatprep.subr.bf16.mxu1 %v2564_v25  ;;  %v1456_v40 = vmul.f32 %v1452_v33, %v1448_v30 }
 0x3bf   : > { %v1451_v29 = vmax.f32 %v1447_v18, 0.0  ;;  %2535 = vmatpush3.bf16.msra.mxu0 %v2534_v31 }
 0x3c0   : > { %1595 = vmatprep.mubr.f32.mxu0 %v1457_v32  ;;  %v1458_v41 = vmul.f32 %v1454_v37, %v1450_v35  ;;  %2568 = vmatprep.subr.bf16.mxu0 %v3203_v43 }
 0x3c1   : > { %v1459_v34 = vmul.f32 %v1455_v23, %v1451_v29  ;;  %2567 = vmatpush3.bf16.msra.mxu1 %v2566_v36 }
 0x3c2   : > { %1596 = vmatmul.mubr.f32.vlgmr.msra.gmra.mrb[0].mxu0 %v1456_v40 }
 0x3c3   : > { %1665 = vmatprep.mubr.f32.mxu1 %v1459_v34  ;;  %2570 = vmatpush3.bf16.msra.mxu0 %v2569_v42 }
 0x3c4   : > { %1666 = vmatmul.mubr.f32.vlgmr.msra.gmra.mrb[0].mxu1 %v1458_v41  ;;  %2571 = vmatprep.subr.bf16.mxu0 %v3203_v43 }
 0x3c5   : > { %2276 = vmatprep.mubr.msk.f32.mxu0 %vm3204_vm1, %v3205_v2 }
 0x3c7   : > { %2573 = vmatpush3.bf16.msra.mxu0 %v2572_v46 }
 0x3c8   : > { %2574 = vmatprep.subr.bf16.mxu0 %v3203_v43 }
 0x3cb   : > { %2576 = vmatpush3.bf16.msra.mxu0 %v2575_v49 }
 0x3cc   : > { %2577 = vmatprep.subr.bf16.mxu0 %v3203_v43 }
 0x3cf   : > { %2579 = vmatpush3.bf16.msra.mxu0 %v2578_v53 }
 0x3d0   : > { %2580 = vmatprep.subr.bf16.mxu0 %v3203_v43 }
 0x3d3   : > { %2582 = vmatpush3.bf16.msra.mxu0 %v2581_v56 }
 0x3d4   : > { %2583 = vmatprep.subr.bf16.mxu0 %v3203_v43 }
 0x3d7   : > { %2585 = vmatpush3.bf16.msra.mxu0 %v2584_v59 }
 0x3d8   : > { %2586 = vmatprep.subr.bf16.mxu0 %v3203_v43 }
 0x3db   : > { %2588 = vmatpush3.bf16.msra.mxu0 %v2587_v62 }
 0x3dc   : > { %2589 = vmatprep.subr.bf16.mxu0 %v3203_v43 }
 0x3df   : > { %2591 = vmatpush3.bf16.msra.mxu0 %v2590_v1 }
 0x495   : > { %v2189_v3 = vpop.f32.mrb[0].mxu0 }
 0x496   : > { %v2190_v5 = vpop.f32.mrb[1].mxu0 }
 0x497   : > { %v2224_v52 = vpop.f32.mrb[0].mxu1  ;;  %v2191_v6 = vadd.f32 %v2190_v5, %v2189_v3 }
 0x498   : > { %v2225_v7 = vpop.f32.mrb[1].mxu1 }
 0x499   : > { %v2226_v8 = vadd.f32 %v2225_v7, %v2224_v52  ;;  %v1598_v9 = vadd.f32 %v2191_v6, %v1986_v4 }
 0x49b   : > { %v1668_v10 = vadd.f32 %v2226_v8, %v1598_v9 }
 0x49d   : > { %v1671_v12 = vmax.f32 %v1668_v10, 0.0 }
 0x49f   : > { %v1673_v13 = vmul.f32 %v1672_v11, %v1671_v12 }
 0x4a1   : > { %2277 = vmatmul.mubr.f32.vlgmr.msra.gmra.mrb[2].mxu0 %v1673_v13 }
 0x574   : > { %v1763_v15 = vpop.f32.mrb[2].mxu0 }
 0x575   : > { %v1764_v16 = vadd.f32 %v1987_v14, %v1763_v15  ;;  %v2278_v17 = vpop.f32.mrb[3].mxu0 }
 0x577   : > { %1767 = vst [vmem:[#allocation21] sm:$0xff] %v1764_v16 }
 0x578 PF: > { %p2693_p2 = scmp.eq.s32.totalorder %s3298_s23, 24  ;;  %s3206_s14 = smov [#allocation21]  }
 0x579   : > { %s1777_s27 = sshll.u32 %s3206_s14, 4  ;;  %s1778_s27 = int_to_ptr.vmem [resolvable:$true] %s1777_s27 }
 0x57a   : > { %s3077_s0 = scalar_lea.vmem %s1778_s27, 128  ;;  %p3084_p6 = scmp.lt.s32.totalorder %s1778_s27, %s1778_s27 }
 0x57b   : > { %p3078_p8 = scmp.ne.s32.totalorder %s1778_s27, %s3077_s0  ;;  %p3085_p9 = scmp.lt.s32.totalorder %s3077_s0, %s3077_s0 }
 0x57d   : > { %p3079_p12 = pnand %p3078_p8, %p2693_p2  ;;  %p3086_p7 = por %p3085_p9, %p3084_p6 }
 0x57f   : > { %p3080_p5 = pneg %p3079_p12 }
 0x581   : > { %p3087_p1 = pnand %p3086_p7, %p3080_p5 }
 0x583   : > { %3090 = shalt.err (!%p3087_p1)
}
 0x584   : > { %s3853_s5 = sld [smem:[#allocation38_spill]] }
 0x58a   : > { %s3091_s29 = scalar_lea.hbm %s3853_s5, 128 }
 0x58b   : > { %p3092_p3 = scmp.ne.s32.totalorder %s3853_s5, %s3091_s29  ;;  %p3097_p11 = scmp.lt.u32.totalorder %s3091_s29, %s3853_s5 }
 0x58d   : > { %p3093_p10 = pnand %p3092_p3, %p2693_p2 }
 0x58f   : > { %p3094_p4 = pneg %p3093_p10 }
 0x591   : > { %p3099_p13 = pnand %p3097_p11, %p3094_p4 }
 0x593   : > { %3102 = shalt.err (!%p3099_p13)
}
 0x594   : > { %2636 = dma.vmem_to_hbm [thread:$0]  (%p2693_p2), %s1778_s27, 128, %s3853_s5, [#allocation5]  }
 0x595   : > { %3156 = dma.done.wait (%p2693_p2), [#allocation5], 128  }
 0x596   : > { %3158 = vsyncadd (%p2693_p2), [#allocation5], 4294967168 }
 0x597 PF: > { %s32_s22 = sadd.s32 1, %s3181_s22   ;;  %s3854_s17 = smov %s3165_s18 }
 0x598   : > { %p29_p0 = scmp.ge.s32.totalorder %s32_s22, 27   ;;  %s3855_s18 = smov %s3169_s19 }
 0x599   : > { %s3856_s19 = smov %s3532_s16  ;;  %s3857_s20 = smov %s3177_s21 }
 0x59a   : > { %s3858_s21 = smov %s3860_s11  ;;  %31 = sbr.rel (!%p29_p0) target bundleno = 19 (0x13), region = 161 }
 0x5a1   :  { %1790 = vsyncpa [#allocation4], 1 }
 0x5a2   :  { %1792 = vsyncpa [#allocation4 + $0x1], 1 }
 0x5a3   :  { %1793 = vsyncpa [#allocation7], 1 }
 0x5a4   :  { %1794 = vsyncpa [#allocation10], 1 }
 0x5a5   :  { %1796 = vsyncpa [#allocation10 + $0x1], 1 }
 0x5a6   :  { %1797 = vsyncpa [#allocation13], 1 }
 0x5a7   :  { %1798 = vsyncpa [#allocation16], 1 }
 0x5a8   :  { %1799 = vsyncpa [#allocation19], 1 }
 0x5a9   :  { %1800 = vsyncpa [#allocation5], 1 }
 0x5aa   :  { %1802 = vsyncpa [#allocation5 + $0x1], 1 }

</bundles_post_ra>
